<compile_context>
chip_gen: v7x
topology: tpu7x:2x2x1
jax: 0.10.0
libtpu: 0.0.40
codegen_flags: <defaults>
</compile_context>

<pallas_src>
import functools

import jax
import jax.numpy as jnp
from jax import lax
from jax.experimental import pallas as pl
from jax.experimental.pallas import tpu as pltpu


def _round_up(a, m):
    return (a + m - 1) // m * m


def _unet_encoder_kernel(x_ref, mask_ref, w1_ref, b1_ref, w2_ref, b2_ref,
                         out_ref, pool_ref, patch_ref,
                         *, H, P, C_in, C_out, K, R1, R2):
    S1 = R1 * P          # conv1 output plane length (padded coords + slack rows)
    S2 = R2 * P          # conv2 output plane length (top-left coords + 1 slack row)
    HP = H * P

    def conv3x3(plane, w_ref, b_ref, c_in, rows_out):
        """3x3 conv of a bf16 flat plane -> f32 (C_out, rows_out*P) with bias added.

        kx-major im2col: only K lane-shifted bf16 copies of the plane are stored; the
        per-ky RHS slices start at multiples of P (P % 128 == 0), so they are pure
        vreg-column addressing and need no XLU rotate.  The one shared patch_ref is
        reused by both convs so peak scratch = max(patch1, patch2), not their sum.
        """
        S = rows_out * P
        L = (rows_out + K - 1) * P
        for kx in range(K):
            patch_ref[kx * c_in:(kx + 1) * c_in, 0:L] = plane[:, kx:kx + L]
        acc = jnp.dot(w_ref[0], patch_ref[0:K * c_in, 0:S],
                      preferred_element_type=jnp.float32)
        for ky in range(1, K):
            acc = acc + jnp.dot(w_ref[ky],
                                patch_ref[0:K * c_in, ky * P:ky * P + S],
                                preferred_element_type=jnp.float32)
        return acc + b_ref[...]

    x = x_ref[0]                                                  # (C_in, R_in*P) bf16

    # conv1 + ReLU (f32 element-wise); the 0/1 mask zeroes padding / slack positions,
    # so y1 IS the zero-padded conv1 output that conv2 consumes.  One bf16 cast here.
    y1 = (jnp.maximum(conv3x3(x, w1_ref, b1_ref, C_in, R1), 0.0)
          * mask_ref[...]).astype(jnp.bfloat16)                   # (C_out, S1) bf16

    # conv2 + ReLU
    y2 = jnp.maximum(conv3x3(y1, w2_ref, b2_ref, C_out, R2), 0.0)  # (C_out, S2) f32

    # Skip-connection output: valid rows [0, H); wrapper trims columns to W. bf16 store.
    out_ref[0] = y2[:, :HP].astype(out_ref.dtype)

    # 2x2 max pool, row-compacted in kernel: pooled row h = max over rows 2h, 2h+1 and
    # the col/col+1 pair (anchored at every column; wrapper keeps even cols < W).
    # y2s is the col+1 neighbour; the single slack row in R2 keeps the slice in range.
    y2s = y2[:, 1:HP + 1]
    rows = []
    for h in range(H // 2):
        r0 = 2 * h * P
        r1 = r0 + P
        rows.append(jnp.maximum(jnp.maximum(y2[:, r0:r0 + P], y2s[:, r0:r0 + P]),
                                jnp.maximum(y2[:, r1:r1 + P], y2s[:, r1:r1 + P])))
    pool_ref[0] = jnp.concatenate(rows, axis=1).astype(pool_ref.dtype)


def unet_encoder_block(x_nchw, w1, b1, w2, b2, *, out_dtype=jnp.float32):
    """Matches UnetEncoderBlock.forward: returns (output, output_pool), both NCHW."""
    B, C_in, H, W = x_nchw.shape
    C_out, _, K, _ = w1.shape
    assert K % 2 == 1 and H % 2 == 0 and W % 2 == 0
    pad = (K - 1) // 2

    # Row stride P: wide enough that w + kx never crosses a row for valid outputs, and a
    # multiple of 128 so ky*P shifts / per-row slices are vreg-column addressing.
    P = _round_up(W + 3 * pad, 128)
    R2 = H + 1            # conv2 rows computed (+1 slack row for the pool's col+1 view)
    R1 = R2 + K           # conv1 rows computed (so conv2's shifted views stay in range)
    R_in = R1 + K         # padded-input rows   (so conv1's shifted views stay in range)
    HP = H * P

    # NCHW is already channel-major: pad spatially (2*pad top/left so conv1 lands directly
    # in conv2's zero-padded coordinates; extra zero rows/cols keep every static shift in
    # range), flatten (rows, cols) -> one lane axis with stride P, cast to bf16.
    xp = jnp.pad(x_nchw, ((0, 0), (0, 0),
                          (2 * pad, R_in - H - 2 * pad),
                          (2 * pad, P - W - 2 * pad)))
    xf = xp.reshape(B, C_in, R_in * P).astype(jnp.bfloat16)

    # Weights OIHW -> (K, C_out, K*C) with inner row order (kx, ci): one (C_out, K*C)
    # matrix per ky for the K accumulating matmuls.
    w1m = jnp.transpose(w1, (2, 0, 3, 1)).reshape(K, C_out, K * C_in).astype(jnp.bfloat16)
    w2m = jnp.transpose(w2, (2, 0, 3, 1)).reshape(K, C_out, K * C_out).astype(jnp.bfloat16)
    b1m = b1.reshape(C_out, 1).astype(jnp.float32)
    b2m = b2.reshape(C_out, 1).astype(jnp.float32)

    # Validity mask for conv1's (padded-coordinate) output plane.
    rr = jnp.arange(R1)[:, None]
    cc = jnp.arange(P)[None, :]
    mask = (((rr >= pad) & (rr < H + pad)) &
            ((cc >= pad) & (cc < W + pad))).astype(jnp.float32).reshape(1, R1 * P)

    kernel = functools.partial(_unet_encoder_kernel,
                               H=H, P=P, C_in=C_in, C_out=C_out, K=K, R1=R1, R2=R2)

    # Shared bf16 patch scratch sized for the larger of the two convs.
    patch_rows = K * max(C_in, C_out)
    patch_cols = (R1 + K - 1) * P

    out_flat, pool_flat = pl.pallas_call(
        kernel,
        out_shape=(jax.ShapeDtypeStruct((B, C_out, HP), jnp.bfloat16),
                   jax.ShapeDtypeStruct((B, C_out, (H // 2) * P), jnp.bfloat16)),
        grid_spec=pltpu.PrefetchScalarGridSpec(
            num_scalar_prefetch=0,
            grid=(B,),   # one image per step; even grid keeps both v7x TCs busy
            in_specs=[
                pl.BlockSpec((1, C_in, R_in * P), lambda b: (b, 0, 0)),
                pl.BlockSpec((1, R1 * P), lambda b: (0, 0)),
                pl.BlockSpec((K, C_out, K * C_in), lambda b: (0, 0, 0)),
                pl.BlockSpec((C_out, 1), lambda b: (0, 0)),
                pl.BlockSpec((K, C_out, K * C_out), lambda b: (0, 0, 0)),
                pl.BlockSpec((C_out, 1), lambda b: (0, 0)),
            ],
            out_specs=(
                pl.BlockSpec((1, C_out, HP), lambda b: (b, 0, 0)),
                pl.BlockSpec((1, C_out, (H // 2) * P), lambda b: (b, 0, 0)),
            ),
            scratch_shapes=[pltpu.VMEM((patch_rows, patch_cols), jnp.bfloat16)],
        ),
        compiler_params=pltpu.CompilerParams(
            dimension_semantics=("parallel",),
            vmem_limit_bytes=32 * 1024 * 1024),
    )(xf, mask, w1m, b1m, w2m, b2m)

    # Lane-dense bf16 kernel outputs: unflatten, drop slack columns (and odd pool cols),
    # and cast back to the module's f32 (a real consumer would take bf16 directly).
    out = out_flat.reshape(B, C_out, H, P)[:, :, :, :W].astype(out_dtype)
    pool = pool_flat.reshape(B, C_out, H // 2, P)[:, :, :, 0:W:2].astype(out_dtype)
    return out, pool


def _reference(x, w1, b1, w2, b2):
    """Pure-XLA reference.  Matmul operands are rounded to bf16 exactly like the kernel
    (MXU consumes bf16 operands, accumulates in f32), so tolerances stay modest."""
    bf = lambda a: a.astype(jnp.bfloat16).astype(jnp.float32)
    dn = ("NCHW", "OIHW", "NCHW")
    y = lax.conv_general_dilated(bf(x), bf(w1), (1, 1), "SAME", dimension_numbers=dn,
                                 precision=lax.Precision.HIGHEST)
    y = jax.nn.relu(y + b1[None, :, None, None])
    y = lax.conv_general_dilated(bf(y), bf(w2), (1, 1), "SAME", dimension_numbers=dn,
                                 precision=lax.Precision.HIGHEST)
    y = jax.nn.relu(y + b2[None, :, None, None])
    pool = lax.reduce_window(y, -jnp.inf, lax.max, (1, 1, 2, 2), (1, 1, 2, 2), "VALID")
    return y, pool


if __name__ == "__main__":
    B, C_in, C_out, H, W, K = 2, 4, 8, 16, 16, 3

    key = jax.random.PRNGKey(0)
    k1, k2, k3, k4, k5 = jax.random.split(key, 5)
    x = jax.random.normal(k1, (B, C_in, H, W), jnp.float32)
    w1 = 0.1 * jax.random.normal(k2, (C_out, C_in, K, K), jnp.float32)
    b1 = 0.1 * jax.random.normal(k3, (C_out,), jnp.float32)
    w2 = 0.1 * jax.random.normal(k4, (C_out, C_out, K, K), jnp.float32)
    b2 = 0.1 * jax.random.normal(k5, (C_out,), jnp.float32)

    out, out_pool = jax.jit(unet_encoder_block)(x, w1, b1, w2, b2)
    out, out_pool = jax.block_until_ready((out, out_pool))

    ref_out, ref_pool = _reference(x, w1, b1, w2, b2)
    assert out.shape == (B, C_out, H, W)
    assert out_pool.shape == (B, C_out, H // 2, W // 2)
    assert jnp.allclose(out, ref_out, rtol=2e-2, atol=2e-2), \
        float(jnp.max(jnp.abs(out - ref_out)))
    assert jnp.allclose(out_pool, ref_pool, rtol=2e-2, atol=2e-2), \
        float(jnp.max(jnp.abs(out_pool - ref_pool)))

    print("KERNEL_OK")
</pallas_src>

<mosaic_0001>
module attributes {stable_mosaic.version = 11 : i64} {
  func.func @_unet_encoder_kernel(%arg0: i32, %arg1: memref<1x4x2944xbf16, #tpu.memory_space<vmem>>, %arg2: memref<1x2560xf32, #tpu.memory_space<vmem>>, %arg3: memref<3x8x12xbf16, #tpu.memory_space<vmem>>, %arg4: memref<8x1xf32, #tpu.memory_space<vmem>>, %arg5: memref<3x8x24xbf16, #tpu.memory_space<vmem>>, %arg6: memref<8x1xf32, #tpu.memory_space<vmem>>, %arg7: memref<1x8x2048xbf16, #tpu.memory_space<vmem>>, %arg8: memref<1x8x1024xbf16, #tpu.memory_space<vmem>>, %arg9: memref<24x2816xbf16, #tpu.memory_space<vmem>>) attributes {dimension_semantics = [#tpu.dimension_semantics<parallel>], iteration_bounds = array<i64: 2>, scalar_prefetch = 0 : i64, scratch_operands = 1 : i64, tpu.core_type = #tpu.core_type<tc>, window_params = [{transform_indices = @transform_0, window_bounds = array<i64: 1, 4, 2944>}, {pipeline_mode = #tpu.pipeline_mode<synchronous>, transform_indices = @transform_1, window_bounds = array<i64: 1, 2560>}, {pipeline_mode = #tpu.pipeline_mode<synchronous>, transform_indices = @transform_2, window_bounds = array<i64: 3, 8, 12>}, {pipeline_mode = #tpu.pipeline_mode<synchronous>, transform_indices = @transform_3, window_bounds = array<i64: 8, 1>}, {pipeline_mode = #tpu.pipeline_mode<synchronous>, transform_indices = @transform_4, window_bounds = array<i64: 3, 8, 24>}, {pipeline_mode = #tpu.pipeline_mode<synchronous>, transform_indices = @transform_5, window_bounds = array<i64: 8, 1>}, {transform_indices = @transform_6, window_bounds = array<i64: 1, 8, 2048>}, {transform_indices = @transform_7, window_bounds = array<i64: 1, 8, 1024>}]} {
    %c0 = arith.constant 0 : index
    %c0_0 = arith.constant 0 : index
    %c0_1 = arith.constant 0 : index
    %0 = vector.load %arg1[%c0, %c0_0, %c0_1] : memref<1x4x2944xbf16, #tpu.memory_space<vmem>>, vector<1x4x2944xbf16>
    %1 = vector.shape_cast %0 : vector<1x4x2944xbf16> to vector<4x2944xbf16>
    %2 = vector.extract_strided_slice %1 {offsets = [0, 0], sizes = [4, 2816], strides = [1, 1]} : vector<4x2944xbf16> to vector<4x2816xbf16>
    %c0_2 = arith.constant 0 : index
    %c0_3 = arith.constant 0 : index
    %3 = vector.load %arg9[%c0_2, %c0_3] : memref<24x2816xbf16, #tpu.memory_space<vmem>>, vector<4x2816xbf16>
    tpu.vector_store %arg9[%c0_2, %c0_3], %2 {strides = array<i32>} : memref<24x2816xbf16, #tpu.memory_space<vmem>>, vector<4x2816xbf16>,
    %4 = vector.extract_strided_slice %1 {offsets = [0, 1], sizes = [4, 2816], strides = [1, 1]} : vector<4x2944xbf16> to vector<4x2816xbf16>
    %c4 = arith.constant 4 : index
    %c0_4 = arith.constant 0 : index
    %5 = vector.load %arg9[%c4, %c0_4] : memref<24x2816xbf16, #tpu.memory_space<vmem>>, vector<4x2816xbf16>
    tpu.vector_store %arg9[%c4, %c0_4], %4 {strides = array<i32>} : memref<24x2816xbf16, #tpu.memory_space<vmem>>, vector<4x2816xbf16>,
    %6 = vector.extract_strided_slice %1 {offsets = [0, 2], sizes = [4, 2816], strides = [1, 1]} : vector<4x2944xbf16> to vector<4x2816xbf16>
    %c8 = arith.constant 8 : index
    %c0_5 = arith.constant 0 : index
    %7 = vector.load %arg9[%c8, %c0_5] : memref<24x2816xbf16, #tpu.memory_space<vmem>>, vector<4x2816xbf16>
    tpu.vector_store %arg9[%c8, %c0_5], %6 {strides = array<i32>} : memref<24x2816xbf16, #tpu.memory_space<vmem>>, vector<4x2816xbf16>,
    %c0_6 = arith.constant 0 : index
    %c0_7 = arith.constant 0 : index
    %c0_8 = arith.constant 0 : index
    %8 = vector.load %arg3[%c0_6, %c0_7, %c0_8] : memref<3x8x12xbf16, #tpu.memory_space<vmem>>, vector<1x8x12xbf16>
    %9 = vector.shape_cast %8 : vector<1x8x12xbf16> to vector<8x12xbf16>
    %c0_9 = arith.constant 0 : index
    %c0_10 = arith.constant 0 : index
    %10 = vector.load %arg9[%c0_9, %c0_10] : memref<24x2816xbf16, #tpu.memory_space<vmem>>, vector<12x2560xbf16>
    %cst = arith.constant dense<0.000000e+00> : vector<8x2560xf32>
    %11 = tpu.matmul %9, %10, %cst {dimension_numbers = #tpu.dot_dimension_numbers<[1], [0], [0], [1], [0, 0, 1, 1], [], []>} : vector<8x12xbf16>, vector<12x2560xbf16>, vector<8x2560xf32> -> vector<8x2560xf32>
    %c1 = arith.constant 1 : index
    %c0_11 = arith.constant 0 : index
    %c0_12 = arith.constant 0 : index
    %12 = vector.load %arg3[%c1, %c0_11, %c0_12] : memref<3x8x12xbf16, #tpu.memory_space<vmem>>, vector<1x8x12xbf16>
    %13 = vector.shape_cast %12 : vector<1x8x12xbf16> to vector<8x12xbf16>
    %c0_13 = arith.constant 0 : index
    %c128 = arith.constant 128 : index
    %14 = vector.load %arg9[%c0_13, %c128] : memref<24x2816xbf16, #tpu.memory_space<vmem>>, vector<12x2560xbf16>
    %cst_14 = arith.constant dense<0.000000e+00> : vector<8x2560xf32>
    %15 = tpu.matmul %13, %14, %cst_14 {dimension_numbers = #tpu.dot_dimension_numbers<[1], [0], [0], [1], [0, 0, 1, 1], [], []>} : vector<8x12xbf16>, vector<12x2560xbf16>, vector<8x2560xf32> -> vector<8x2560xf32>
    %16 = arith.addf %11, %15 : vector<8x2560xf32>
    %c2 = arith.constant 2 : index
    %c0_15 = arith.constant 0 : index
    %c0_16 = arith.constant 0 : index
    %17 = vector.load %arg3[%c2, %c0_15, %c0_16] : memref<3x8x12xbf16, #tpu.memory_space<vmem>>, vector<1x8x12xbf16>
    %18 = vector.shape_cast %17 : vector<1x8x12xbf16> to vector<8x12xbf16>
    %c0_17 = arith.constant 0 : index
    %c256 = arith.constant 256 : index
    %19 = vector.load %arg9[%c0_17, %c256] : memref<24x2816xbf16, #tpu.memory_space<vmem>>, vector<12x2560xbf16>
    %cst_18 = arith.constant dense<0.000000e+00> : vector<8x2560xf32>
    %20 = tpu.matmul %18, %19, %cst_18 {dimension_numbers = #tpu.dot_dimension_numbers<[1], [0], [0], [1], [0, 0, 1, 1], [], []>} : vector<8x12xbf16>, vector<12x2560xbf16>, vector<8x2560xf32> -> vector<8x2560xf32>
    %21 = arith.addf %16, %20 : vector<8x2560xf32>
    %c0_19 = arith.constant 0 : index
    %c0_20 = arith.constant 0 : index
    %22 = vector.load %arg4[%c0_19, %c0_20] : memref<8x1xf32, #tpu.memory_space<vmem>>, vector<8x1xf32>
    %23 = vector.broadcast %22 : vector<8x1xf32> to vector<8x2560xf32>
    %24 = arith.addf %21, %23 : vector<8x2560xf32>
    %cst_21 = arith.constant 0.000000e+00 : f32
    %25 = vector.broadcast %cst_21 : f32 to vector<8x2560xf32>
    %26 = arith.maximumf %24, %25 : vector<8x2560xf32>
    %c0_22 = arith.constant 0 : index
    %c0_23 = arith.constant 0 : index
    %27 = vector.load %arg2[%c0_22, %c0_23] : memref<1x2560xf32, #tpu.memory_space<vmem>>, vector<1x2560xf32>
    %28 = vector.broadcast %27 : vector<1x2560xf32> to vector<8x2560xf32>
    %29 = arith.mulf %26, %28 : vector<8x2560xf32>
    %30 = arith.truncf %29 : vector<8x2560xf32> to vector<8x2560xbf16>
    %31 = vector.extract_strided_slice %30 {offsets = [0, 0], sizes = [8, 2432], strides = [1, 1]} : vector<8x2560xbf16> to vector<8x2432xbf16>
    %c0_24 = arith.constant 0 : index
    %c0_25 = arith.constant 0 : index
    %32 = vector.load %arg9[%c0_24, %c0_25] : memref<24x2816xbf16, #tpu.memory_space<vmem>>, vector<8x2432xbf16>
    tpu.vector_store %arg9[%c0_24, %c0_25], %31 {strides = array<i32>} : memref<24x2816xbf16, #tpu.memory_space<vmem>>, vector<8x2432xbf16>,
    %33 = vector.extract_strided_slice %30 {offsets = [0, 1], sizes = [8, 2432], strides = [1, 1]} : vector<8x2560xbf16> to vector<8x2432xbf16>
    %c8_26 = arith.constant 8 : index
    %c0_27 = arith.constant 0 : index
    %34 = vector.load %arg9[%c8_26, %c0_27] : memref<24x2816xbf16, #tpu.memory_space<vmem>>, vector<8x2432xbf16>
    tpu.vector_store %arg9[%c8_26, %c0_27], %33 {strides = array<i32>} : memref<24x2816xbf16, #tpu.memory_space<vmem>>, vector<8x2432xbf16>,
    %35 = vector.extract_strided_slice %30 {offsets = [0, 2], sizes = [8, 2432], strides = [1, 1]} : vector<8x2560xbf16> to vector<8x2432xbf16>
    %c16 = arith.constant 16 : index
    %c0_28 = arith.constant 0 : index
    %36 = vector.load %arg9[%c16, %c0_28] : memref<24x2816xbf16, #tpu.memory_space<vmem>>, vector<8x2432xbf16>
    tpu.vector_store %arg9[%c16, %c0_28], %35 {strides = array<i32>} : memref<24x2816xbf16, #tpu.memory_space<vmem>>, vector<8x2432xbf16>,
    %c0_29 = arith.constant 0 : index
    %c0_30 = arith.constant 0 : index
    %c0_31 = arith.constant 0 : index
    %37 = vector.load %arg5[%c0_29, %c0_30, %c0_31] : memref<3x8x24xbf16, #tpu.memory_space<vmem>>, vector<1x8x24xbf16>
    %38 = vector.shape_cast %37 : vector<1x8x24xbf16> to vector<8x24xbf16>
    %c0_32 = arith.constant 0 : index
    %c0_33 = arith.constant 0 : index
    %39 = vector.load %arg9[%c0_32, %c0_33] : memref<24x2816xbf16, #tpu.memory_space<vmem>>, vector<24x2176xbf16>
    %cst_34 = arith.constant dense<0.000000e+00> : vector<8x2176xf32>
    %40 = tpu.matmul %38, %39, %cst_34 {dimension_numbers = #tpu.dot_dimension_numbers<[1], [0], [0], [1], [0, 0, 1, 1], [], []>} : vector<8x24xbf16>, vector<24x2176xbf16>, vector<8x2176xf32> -> vector<8x2176xf32>
    %c1_35 = arith.constant 1 : index
    %c0_36 = arith.constant 0 : index
    %c0_37 = arith.constant 0 : index
    %41 = vector.load %arg5[%c1_35, %c0_36, %c0_37] : memref<3x8x24xbf16, #tpu.memory_space<vmem>>, vector<1x8x24xbf16>
    %42 = vector.shape_cast %41 : vector<1x8x24xbf16> to vector<8x24xbf16>
    %c0_38 = arith.constant 0 : index
    %c128_39 = arith.constant 128 : index
    %43 = vector.load %arg9[%c0_38, %c128_39] : memref<24x2816xbf16, #tpu.memory_space<vmem>>, vector<24x2176xbf16>
    %cst_40 = arith.constant dense<0.000000e+00> : vector<8x2176xf32>
    %44 = tpu.matmul %42, %43, %cst_40 {dimension_numbers = #tpu.dot_dimension_numbers<[1], [0], [0], [1], [0, 0, 1, 1], [], []>} : vector<8x24xbf16>, vector<24x2176xbf16>, vector<8x2176xf32> -> vector<8x2176xf32>
    %45 = arith.addf %40, %44 : vector<8x2176xf32>
    %c2_41 = arith.constant 2 : index
    %c0_42 = arith.constant 0 : index
    %c0_43 = arith.constant 0 : index
    %46 = vector.load %arg5[%c2_41, %c0_42, %c0_43] : memref<3x8x24xbf16, #tpu.memory_space<vmem>>, vector<1x8x24xbf16>
    %47 = vector.shape_cast %46 : vector<1x8x24xbf16> to vector<8x24xbf16>
    %c0_44 = arith.constant 0 : index
    %c256_45 = arith.constant 256 : index
    %48 = vector.load %arg9[%c0_44, %c256_45] : memref<24x2816xbf16, #tpu.memory_space<vmem>>, vector<24x2176xbf16>
    %cst_46 = arith.constant dense<0.000000e+00> : vector<8x2176xf32>
    %49 = tpu.matmul %47, %48, %cst_46 {dimension_numbers = #tpu.dot_dimension_numbers<[1], [0], [0], [1], [0, 0, 1, 1], [], []>} : vector<8x24xbf16>, vector<24x2176xbf16>, vector<8x2176xf32> -> vector<8x2176xf32>
    %50 = arith.addf %45, %49 : vector<8x2176xf32>
    %c0_47 = arith.constant 0 : index
    %c0_48 = arith.constant 0 : index
    %51 = vector.load %arg6[%c0_47, %c0_48] : memref<8x1xf32, #tpu.memory_space<vmem>>, vector<8x1xf32>
    %52 = vector.broadcast %51 : vector<8x1xf32> to vector<8x2176xf32>
    %53 = arith.addf %50, %52 : vector<8x2176xf32>
    %cst_49 = arith.constant 0.000000e+00 : f32
    %54 = vector.broadcast %cst_49 : f32 to vector<8x2176xf32>
    %55 = arith.maximumf %53, %54 : vector<8x2176xf32>
    %56 = vector.extract_strided_slice %55 {offsets = [0, 0], sizes = [8, 2048], strides = [1, 1]} : vector<8x2176xf32> to vector<8x2048xf32>
    %57 = arith.truncf %56 : vector<8x2048xf32> to vector<8x2048xbf16>
    %c0_50 = arith.constant 0 : index
    %c0_51 = arith.constant 0 : index
    %c0_52 = arith.constant 0 : index
    %58 = vector.load %arg7[%c0_50, %c0_51, %c0_52] : memref<1x8x2048xbf16, #tpu.memory_space<vmem>>, vector<1x8x2048xbf16>
    %59 = vector.shape_cast %58 : vector<1x8x2048xbf16> to vector<8x2048xbf16>
    %60 = vector.shape_cast %57 : vector<8x2048xbf16> to vector<1x8x2048xbf16>
    tpu.vector_store %arg7[%c0_50, %c0_51, %c0_52], %60 {strides = array<i32>} : memref<1x8x2048xbf16, #tpu.memory_space<vmem>>, vector<1x8x2048xbf16>,
    %61 = vector.extract_strided_slice %55 {offsets = [0, 1], sizes = [8, 2048], strides = [1, 1]} : vector<8x2176xf32> to vector<8x2048xf32>
    %62 = vector.extract_strided_slice %55 {offsets = [0, 0], sizes = [8, 128], strides = [1, 1]} : vector<8x2176xf32> to vector<8x128xf32>
    %63 = vector.extract_strided_slice %61 {offsets = [0, 0], sizes = [8, 128], strides = [1, 1]} : vector<8x2048xf32> to vector<8x128xf32>
    %64 = arith.maximumf %62, %63 : vector<8x128xf32>
    %65 = vector.extract_strided_slice %55 {offsets = [0, 128], sizes = [8, 128], strides = [1, 1]} : vector<8x2176xf32> to vector<8x128xf32>
    %66 = vector.extract_strided_slice %61 {offsets = [0, 128], sizes = [8, 128], strides = [1, 1]} : vector<8x2048xf32> to vector<8x128xf32>
    %67 = arith.maximumf %65, %66 : vector<8x128xf32>
    %68 = arith.maximumf %64, %67 : vector<8x128xf32>
    %69 = vector.extract_strided_slice %55 {offsets = [0, 256], sizes = [8, 128], strides = [1, 1]} : vector<8x2176xf32> to vector<8x128xf32>
    %70 = vector.extract_strided_slice %61 {offsets = [0, 256], sizes = [8, 128], strides = [1, 1]} : vector<8x2048xf32> to vector<8x128xf32>
    %71 = arith.maximumf %69, %70 : vector<8x128xf32>
    %72 = vector.extract_strided_slice %55 {offsets = [0, 384], sizes = [8, 128], strides = [1, 1]} : vector<8x2176xf32> to vector<8x128xf32>
    %73 = vector.extract_strided_slice %61 {offsets = [0, 384], sizes = [8, 128], strides = [1, 1]} : vector<8x2048xf32> to vector<8x128xf32>
    %74 = arith.maximumf %72, %73 : vector<8x128xf32>
    %75 = arith.maximumf %71, %74 : vector<8x128xf32>
    %76 = vector.extract_strided_slice %55 {offsets = [0, 512], sizes = [8, 128], strides = [1, 1]} : vector<8x2176xf32> to vector<8x128xf32>
    %77 = vector.extract_strided_slice %61 {offsets = [0, 512], sizes = [8, 128], strides = [1, 1]} : vector<8x2048xf32> to vector<8x128xf32>
    %78 = arith.maximumf %76, %77 : vector<8x128xf32>
    %79 = vector.extract_strided_slice %55 {offsets = [0, 640], sizes = [8, 128], strides = [1, 1]} : vector<8x2176xf32> to vector<8x128xf32>
    %80 = vector.extract_strided_slice %61 {offsets = [0, 640], sizes = [8, 128], strides = [1, 1]} : vector<8x2048xf32> to vector<8x128xf32>
    %81 = arith.maximumf %79, %80 : vector<8x128xf32>
    %82 = arith.maximumf %78, %81 : vector<8x128xf32>
    %83 = vector.extract_strided_slice %55 {offsets = [0, 768], sizes = [8, 128], strides = [1, 1]} : vector<8x2176xf32> to vector<8x128xf32>
    %84 = vector.extract_strided_slice %61 {offsets = [0, 768], sizes = [8, 128], strides = [1, 1]} : vector<8x2048xf32> to vector<8x128xf32>
    %85 = arith.maximumf %83, %84 : vector<8x128xf32>
    %86 = vector.extract_strided_slice %55 {offsets = [0, 896], sizes = [8, 128], strides = [1, 1]} : vector<8x2176xf32> to vector<8x128xf32>
    %87 = vector.extract_strided_slice %61 {offsets = [0, 896], sizes = [8, 128], strides = [1, 1]} : vector<8x2048xf32> to vector<8x128xf32>
    %88 = arith.maximumf %86, %87 : vector<8x128xf32>
    %89 = arith.maximumf %85, %88 : vector<8x128xf32>
    %90 = vector.extract_strided_slice %55 {offsets = [0, 1024], sizes = [8, 128], strides = [1, 1]} : vector<8x2176xf32> to vector<8x128xf32>
    %91 = vector.extract_strided_slice %61 {offsets = [0, 1024], sizes = [8, 128], strides = [1, 1]} : vector<8x2048xf32> to vector<8x128xf32>
    %92 = arith.maximumf %90, %91 : vector<8x128xf32>
    %93 = vector.extract_strided_slice %55 {offsets = [0, 1152], sizes = [8, 128], strides = [1, 1]} : vector<8x2176xf32> to vector<8x128xf32>
    %94 = vector.extract_strided_slice %61 {offsets = [0, 1152], sizes = [8, 128], strides = [1, 1]} : vector<8x2048xf32> to vector<8x128xf32>
    %95 = arith.maximumf %93, %94 : vector<8x128xf32>
    %96 = arith.maximumf %92, %95 : vector<8x128xf32>
    %97 = vector.extract_strided_slice %55 {offsets = [0, 1280], sizes = [8, 128], strides = [1, 1]} : vector<8x2176xf32> to vector<8x128xf32>
    %98 = vector.extract_strided_slice %61 {offsets = [0, 1280], sizes = [8, 128], strides = [1, 1]} : vector<8x2048xf32> to vector<8x128xf32>
    %99 = arith.maximumf %97, %98 : vector<8x128xf32>
    %100 = vector.extract_strided_slice %55 {offsets = [0, 1408], sizes = [8, 128], strides = [1, 1]} : vector<8x2176xf32> to vector<8x128xf32>
    %101 = vector.extract_strided_slice %61 {offsets = [0, 1408], sizes = [8, 128], strides = [1, 1]} : vector<8x2048xf32> to vector<8x128xf32>
    %102 = arith.maximumf %100, %101 : vector<8x128xf32>
    %103 = arith.maximumf %99, %102 : vector<8x128xf32>
    %104 = vector.extract_strided_slice %55 {offsets = [0, 1536], sizes = [8, 128], strides = [1, 1]} : vector<8x2176xf32> to vector<8x128xf32>
    %105 = vector.extract_strided_slice %61 {offsets = [0, 1536], sizes = [8, 128], strides = [1, 1]} : vector<8x2048xf32> to vector<8x128xf32>
    %106 = arith.maximumf %104, %105 : vector<8x128xf32>
    %107 = vector.extract_strided_slice %55 {offsets = [0, 1664], sizes = [8, 128], strides = [1, 1]} : vector<8x2176xf32> to vector<8x128xf32>
    %108 = vector.extract_strided_slice %61 {offsets = [0, 1664], sizes = [8, 128], strides = [1, 1]} : vector<8x2048xf32> to vector<8x128xf32>
    %109 = arith.maximumf %107, %108 : vector<8x128xf32>
    %110 = arith.maximumf %106, %109 : vector<8x128xf32>
    %111 = vector.extract_strided_slice %55 {offsets = [0, 1792], sizes = [8, 128], strides = [1, 1]} : vector<8x2176xf32> to vector<8x128xf32>
    %112 = vector.extract_strided_slice %61 {offsets = [0, 1792], sizes = [8, 128], strides = [1, 1]} : vector<8x2048xf32> to vector<8x128xf32>
    %113 = arith.maximumf %111, %112 : vector<8x128xf32>
    %114 = vector.extract_strided_slice %55 {offsets = [0, 1920], sizes = [8, 128], strides = [1, 1]} : vector<8x2176xf32> to vector<8x128xf32>
    %115 = vector.extract_strided_slice %61 {offsets = [0, 1920], sizes = [8, 128], strides = [1, 1]} : vector<8x2048xf32> to vector<8x128xf32>
    %116 = arith.maximumf %114, %115 : vector<8x128xf32>
    %117 = arith.maximumf %113, %116 : vector<8x128xf32>
    %118 = tpu.concatenate %68, %75, %82, %89, %96, %103, %110, %117 in 1 : vector<8x128xf32>, vector<8x128xf32>, vector<8x128xf32>, vector<8x128xf32>, vector<8x128xf32>, vector<8x128xf32>, vector<8x128xf32>, vector<8x128xf32> -> vector<8x1024xf32>
    %119 = arith.truncf %118 : vector<8x1024xf32> to vector<8x1024xbf16>
    %c0_53 = arith.constant 0 : index
    %c0_54 = arith.constant 0 : index
    %c0_55 = arith.constant 0 : index
    %120 = vector.load %arg8[%c0_53, %c0_54, %c0_55] : memref<1x8x1024xbf16, #tpu.memory_space<vmem>>, vector<1x8x1024xbf16>
    %121 = vector.shape_cast %120 : vector<1x8x1024xbf16> to vector<8x1024xbf16>
    %122 = vector.shape_cast %119 : vector<8x1024xbf16> to vector<1x8x1024xbf16>
    tpu.vector_store %arg8[%c0_53, %c0_54, %c0_55], %122 {strides = array<i32>} : memref<1x8x1024xbf16, #tpu.memory_space<vmem>>, vector<1x8x1024xbf16>,
    return
  }
  func.func @transform_0(%arg0: i32) -> (i32, i32, i32) {
    %c0_i32 = arith.constant 0 : i32
    %c0_i32_0 = arith.constant 0 : i32
    %c0_i32_1 = arith.constant 0 : i32
    return %arg0, %c0_i32, %c0_i32_0 : i32, i32, i32
  }
  func.func @transform_1(%arg0: i32) -> (i32, i32) {
    %c0_i32 = arith.constant 0 : i32
    %c0_i32_0 = arith.constant 0 : i32
    %c0_i32_1 = arith.constant 0 : i32
    return %c0_i32, %c0_i32_0 : i32, i32
  }
  func.func @transform_2(%arg0: i32) -> (i32, i32, i32) {
    %c0_i32 = arith.constant 0 : i32
    %c0_i32_0 = arith.constant 0 : i32
    %c0_i32_1 = arith.constant 0 : i32
    %c0_i32_2 = arith.constant 0 : i32
    return %c0_i32, %c0_i32_0, %c0_i32_1 : i32, i32, i32
  }
  func.func @transform_3(%arg0: i32) -> (i32, i32) {
    %c0_i32 = arith.constant 0 : i32
    %c0_i32_0 = arith.constant 0 : i32
    %c0_i32_1 = arith.constant 0 : i32
    return %c0_i32, %c0_i32_0 : i32, i32
  }
  func.func @transform_4(%arg0: i32) -> (i32, i32, i32) {
    %c0_i32 = arith.constant 0 : i32
    %c0_i32_0 = arith.constant 0 : i32
    %c0_i32_1 = arith.constant 0 : i32
    %c0_i32_2 = arith.constant 0 : i32
    return %c0_i32, %c0_i32_0, %c0_i32_1 : i32, i32, i32
  }
  func.func @transform_5(%arg0: i32) -> (i32, i32) {
    %c0_i32 = arith.constant 0 : i32
    %c0_i32_0 = arith.constant 0 : i32
    %c0_i32_1 = arith.constant 0 : i32
    return %c0_i32, %c0_i32_0 : i32, i32
  }
  func.func @transform_6(%arg0: i32) -> (i32, i32, i32) {
    %c0_i32 = arith.constant 0 : i32
    %c0_i32_0 = arith.constant 0 : i32
    %c0_i32_1 = arith.constant 0 : i32
    return %arg0, %c0_i32, %c0_i32_0 : i32, i32, i32
  }
  func.func @transform_7(%arg0: i32) -> (i32, i32, i32) {
    %c0_i32 = arith.constant 0 : i32
    %c0_i32_0 = arith.constant 0 : i32
    %c0_i32_1 = arith.constant 0 : i32
    return %arg0, %c0_i32, %c0_i32_0 : i32, i32, i32
  }
}

</mosaic_0001>

<bundles_post_ra>
// kernel: unet_encoder_block.1
= control target key start
LH: loop header
LB: loop body
LE: loop exit
PB: predicated region body
PF: predicated region fallthrough
CT: control target
= control target key end

     0   :  { %s5486_s24 = smov 0   ;;  %s6599_s0 = inlined_call_operand.vmem [shape: bf16[2,4,2944], index: 0, kind: input, shape index: {}]   ;;  %s6600_s1 = inlined_call_operand.vmem [shape: f32[1,2560], index: 1, kind: input, shape index: {}]   ;;  %s6601_s2 = inlined_call_operand.vmem [shape: bf16[3,8,12], index: 2, kind: input, shape index: {}]   ;;  %s6602_s3 = inlined_call_operand.vmem [shape: f32[8,1], index: 3, kind: input, shape index: {}]   ;;  %s6603_s4 = inlined_call_operand.vmem [shape: bf16[3,8,24], index: 4, kind: input, shape index: {}]   ;;  %s6604_s5 = inlined_call_operand.vmem [shape: f32[8,1], index: 5, kind: input, shape index: {}]   ;;  %s6605_s6 = inlined_call_operand.vmem [shape: bf16[2,8,2048], index: 6, kind: output, shape index: {0}]   ;;  %s6606_s7 = inlined_call_operand.vmem [shape: bf16[2,8,1024], index: 7, kind: output, shape index: {1}]  }
   0x1 LB: > { %s4877_s25 = sadd.s32 4294967295, %s5438_s24   ;;  %p4881_p0 = scmp.ge.s32.totalorder %s5438_s24, 1  ;;  %s5438_s24 = sphi %s5486_s24, %s18_s24  }
   0x2   : > { %p240_p1 = scmp.lt.s32.totalorder %s5438_s24, 3 }
   0x4   : > { %p241_p2 = pnand %p4881_p0, %p240_p1 }
   0x5   : > { %p277_p3 = scmp.lt.s32.totalorder (!%p241_p2), %s4877_s25, 1  ;;  %v309_v0 = vlaneseq (!%p241_p2)  ;;  %v5440_v1 = vmov (!%p241_p2), 1983009808   ;;  %s5441_s30 = smov (!%p241_p2), 126   ;;  %v5443_v28 = vmov (!%p241_p2), 0   ;;  %vm493_vm0 = vcmask (!%p241_p2), 1043456  }
   0x6   : > { %244 = sbr.rel (%p241_p2) target bundleno = 1059 (0x423), region = 44  ;;  %v307_v2 = vunpack.c.l.s4 (!%p241_p2), %v5440_v1  ;;  %s5442_s8 = smov (!%p241_p2), 127   ;;  %848 = vmatprep.mubr.bf16.mxu0 (!%p241_p2), %v5443_v28  ;;  %889 = vmatprep.mubr.bf16.mxu1 (!%p241_p2), %v5443_v28  ;;  %vm495_vm1 = vcmask (!%p241_p2), 1039360   ;;  %vm584_vm2 = vcmask (!%p241_p2), 1031168   ;;  %vm755_vm3 = vcmask (!%p241_p2), 1045504  }
   0x7   : > { %v5496_v3 = vshrl.u32 (!%p241_p2), %v309_v0, 7  ;;  %5273 = vset.pattern.permute.xlu0 (!%p241_p2), %v5443_v28  ;;  %vm751_vm4 = vcmask (!%p241_p2), 97280   ;;  %vm2961_vm5 = vcmask (!%p241_p2), 195584   ;;  %vm5445_vm6 = vmmov (!%p241_p2), 0  }
   0x8   : > { %v308_v4 = vunpack.c.0.s8 (!%p241_p2), %v307_v2 }
   0xa   : > { %v5500_v5 = vsub.s32 (!%p241_p2), %v308_v4, %v5496_v3 }
   0xd   : > { %s6608_s25 = smov (!%p277_p3, %s4877_s25), 1 }
   0xe   : > { %s5258_s26 = smul.u32 46, %s6608_s25  ;;  %s5200_s11 = sshll.u32 %s6608_s25, 6 }
   0xf   : > { %s6447_s14 = scalar_lea.vmem %s6605_s6, %s5200_s11 }
  0x10   : > { %s281_s29 = scalar_lea.vmem %s6599_s0, %s5258_s26 }
  0x11   : > { %v293_v6 = vld [vmem:[%s281_s29] sm:$0xff]  ;;  %v294_v7 = vld [vmem:[%s281_s29 + $0x8] sm:$0xff]  ;;  %v295_v8 = vld [vmem:[%s281_s29 + $0x10] sm:$0xff] }
  0x12   : > { %v312_v9 = vrot.slane %v293_v6, %v5500_v5  ;;  %4887 = vst.sshfl [vmem:[#allocation2] sm:$0xf pattern:$0x76325410] %v293_v6  ;;  %v409_v10 = vcombine.low %v293_v6, %v293_v6  ;;  %v296_v11 = vld [vmem:[%s281_s29 + $0x18] sm:$0xff]  ;;  %v297_v12 = vld [vmem:[%s281_s29 + $0x20] sm:$0xff]  ;;  %v327_v14 = vrot.slane %v294_v7, %v5500_v5  ;;  %v305_v15 = vcombine.high %v293_v6, %v293_v6 }
  0x13   : > { %4889 = vst.sshfl [vmem:[#allocation2 + $0x10] sm:$0xf pattern:$0x76325410] %v294_v7  ;;  %v5506_v13 = vld [vmem:[%s281_s29 + $0x28] sm:$0x3f]  ;;  %v320_v16 = vcombine.high %v294_v7, %v294_v7  ;;  %v417_v18 = vcombine.low %v294_v7, %v294_v7  ;;  %v335_v19 = vcombine.high %v295_v8, %v295_v8  ;;  %v350_v20 = vcombine.high %v296_v11, %v296_v11 }
  0x14   : > { %4891 = vst.sshfl [vmem:[#allocation2 + $0x20] sm:$0xf pattern:$0x76325410] %v295_v8  ;;  %547 = vrot.lane.b32.xlu1 %v312_v9, %s5441_s30  ;;  %459 = vrot.lane.b32.xlu0 %v312_v9, %s5442_s8  ;;  %v416_v17 = vrot.slane %v409_v10, %v5500_v5  ;;  %v365_v21 = vcombine.high %v297_v12, %v297_v12  ;;  %v2374_v6 = vld [vmem:[%s6602_s3] sm:$0xff] }
  0x15   : > { %4893 = vst.sshfl [vmem:[#allocation2 + $0x30] sm:$0xf pattern:$0x76325410] %v296_v11  ;;  %v424_v22 = vrot.slane %v417_v18, %v5500_v5  ;;  %v319_v23 = vrot.slane %v305_v15, %v5500_v5  ;;  %v334_v24 = vrot.slane %v320_v16, %v5500_v5  ;;  %v425_v25 = vcombine.low %v295_v8, %v295_v8 }
  0x16   : > { %4895 = vst.sshfl [vmem:[#allocation2 + $0x40] sm:$0xf pattern:$0x76325410] %v297_v12  ;;  %v342_v26 = vrot.slane %v295_v8, %v5500_v5  ;;  %v349_v29 = vrot.slane %v335_v19, %v5500_v5  ;;  %v433_v30 = vcombine.low %v296_v11, %v296_v11  ;;  %v357_v31 = vrot.slane %v296_v11, %v5500_v5 }
  0x17   : > { %4897 = vst.sshfl [vmem:[#allocation2 + $0x50] sm:$0xf pattern:$0x76325410] %v5506_v13  ;;  %v432_v27 = vrot.slane %v425_v25, %v5500_v5  ;;  %v364_v33 = vrot.slane %v350_v20, %v5500_v5  ;;  %v441_v34 = vcombine.low %v297_v12, %v297_v12  ;;  %v372_v35 = vrot.slane %v297_v12, %v5500_v5 }
  0x18   : > { %4888 = vst.sshfl [vmem:[#allocation2 + $0x8] sm:$0xf pattern:$0x76325410] %v305_v15  ;;  %551 = vrot.lane.b32.xlu1 %v327_v14, %s5441_s30  ;;  %457 = vrot.lane.b32.xlu0 %v416_v17, %s5442_s8  ;;  %v440_v32 = vrot.slane %v433_v30, %v5500_v5  ;;  %v379_v37 = vrot.slane %v365_v21, %v5500_v5 }
  0x19   : > { %4890 = vst.sshfl [vmem:[#allocation2 + $0x18] sm:$0xf pattern:$0x76325410] %v320_v16  ;;  %v448_v36 = vrot.slane %v441_v34, %v5500_v5  ;;  %v449_v38 = vcombine.low %v5506_v13, %v5506_v13  ;;  %v386_v39 = vrot.slane %v5506_v13, %v5500_v5  ;;  %v539_v41 = vcombine.high %v5506_v13, %v5506_v13 }
  0x1a   : > { %4892 = vst.sshfl [vmem:[#allocation2 + $0x28] sm:$0xf pattern:$0x76325410] %v335_v19 }
  0x1b   : > { %4894 = vst.sshfl [vmem:[#allocation2 + $0x38] sm:$0xf pattern:$0x76325410] %v350_v20  ;;  %v456_v40 = vrot.slane %v449_v38, %v5500_v5  ;;  %v546_v42 = vrot.slane %v539_v41, %v5500_v5 }
  0x1c   : > { %4896 = vst.sshfl [vmem:[#allocation2 + $0x48] sm:$0xf pattern:$0x76325410] %v365_v21  ;;  %461 = vrot.lane.b32.xlu1 %v424_v22, %s5442_s8  ;;  %549 = vrot.lane.b32.xlu0 %v319_v23, %s5441_s30 }
  0x20   : > { %553 = vrot.lane.b32.xlu1 %v334_v24, %s5441_s30  ;;  %463 = vrot.lane.b32.xlu0 %v327_v14, %s5442_s8 }
  0x24   : > { %555 = vrot.lane.b32.xlu1 %v342_v26, %s5441_s30  ;;  %465 = vrot.lane.b32.xlu0 %v432_v27, %s5442_s8 }
  0x28   : > { %557 = vrot.lane.b32.xlu1 %v349_v29, %s5441_s30  ;;  %467 = vrot.lane.b32.xlu0 %v342_v26, %s5442_s8  ;;  %v5584_v26 = vld [vmem:[%s6601_s2 + $0x4] sm:$0xf] }
  0x2c   : > { %559 = vrot.lane.b32.xlu1 %v357_v31, %s5441_s30  ;;  %469 = vrot.lane.b32.xlu0 %v440_v32, %s5442_s8 }
  0x30   : > { %561 = vrot.lane.b32.xlu1 %v364_v33, %s5441_s30  ;;  %471 = vrot.lane.b32.xlu0 %v357_v31, %s5442_s8 }
  0x34   : > { %563 = vrot.lane.b32.xlu1 %v372_v35, %s5441_s30  ;;  %473 = vrot.lane.b32.xlu0 %v448_v36, %s5442_s8 }
  0x38   : > { %565 = vrot.lane.b32.xlu1 %v379_v37, %s5441_s30  ;;  %475 = vrot.lane.b32.xlu0 %v372_v35, %s5442_s8 }
  0x3c   : > { %567 = vrot.lane.b32.xlu1 %v386_v39, %s5441_s30  ;;  %477 = vrot.lane.b32.xlu0 %v456_v40, %s5442_s8 }
  0x40   : > { %569 = vrot.lane.b32.xlu1 %v546_v42, %s5441_s30  ;;  %479 = vrot.lane.b32.xlu0 %v386_v39, %s5442_s8 }
  0x44   : > { %2377 = vperm.xlu0 %5273, %v2374_v6  }
  0x86   : > { %v548_v43 = vpop.permute.xlu1 %547  ;;  %v460_v44 = vpop.permute.xlu0 %459 }
  0x87   : > { %v482_v47 = vrot.slane %v460_v44, 4  ;;  %v571_v53 = vrot.slane %v548_v43, 4 }
  0x8a   : > { %v552_v45 = vpop.permute.xlu1 %551  ;;  %v458_v46 = vpop.permute.xlu0 %457 }
  0x8b   : > { %v481_v48 = vrot.slane %v458_v46, 4  ;;  %v573_v54 = vrot.slane %v552_v45, 4 }
  0x8d   : > { %v494_v49 = vsel %vm493_vm0, %v481_v48, %v482_v47 }
  0x8e   : > { %v496_v50 = vsel %vm495_vm1, %v458_v46, %v494_v49  ;;  %v462_v51 = vpop.permute.xlu1 %461  ;;  %v550_v52 = vpop.permute.xlu0 %549 }
  0x8f   : > { %528 = vst [vmem:[#allocation2] sm:$0xcc] %v496_v50  ;;  %v483_v55 = vrot.slane %v462_v51, 4  ;;  %v572_v56 = vrot.slane %v550_v52, 4 }
  0x91   : > { %v497_v57 = vsel %vm493_vm0, %v482_v47, %v483_v55  ;;  %v583_v58 = vsel %vm493_vm0, %v571_v53, %v572_v56  ;;  %v586_v59 = vsel %vm493_vm0, %v572_v56, %v573_v54 }
  0x92   : > { %v498_v60 = vsel %vm495_vm1, %v460_v44, %v497_v57  ;;  %v585_v61 = vsel %vm584_vm2, %v548_v43, %v583_v58  ;;  %v587_v62 = vsel %vm584_vm2, %v550_v52, %v586_v59  ;;  %v554_v63 = vpop.permute.xlu1 %553  ;;  %v464_v0 = vpop.permute.xlu0 %463 }
  0x93   : > { %529 = vst [vmem:[#allocation2 + $0x8] sm:$0xcc] %v498_v60  ;;  %617 = vst [vmem:[#allocation2 + $0x58] sm:$0x33] %v585_v61  ;;  %v574_v1 = vrot.slane %v554_v63, 4  ;;  %v484_v2 = vrot.slane %v464_v0, 4 }
  0x94   : > { %618 = vst [vmem:[#allocation2 + $0x60] sm:$0x33] %v587_v62 }
  0x95   : > { %v588_v4 = vsel %vm493_vm0, %v573_v54, %v574_v1  ;;  %v499_v5 = vsel %vm493_vm0, %v483_v55, %v484_v2 }
  0x96   : > { %v589_v7 = vsel %vm584_vm2, %v552_v45, %v588_v4  ;;  %v500_v8 = vsel %vm495_vm1, %v462_v51, %v499_v5  ;;  %v556_v9 = vpop.permute.xlu1 %555  ;;  %v466_v10 = vpop.permute.xlu0 %465 }
  0x97   : > { %619 = vst [vmem:[#allocation2 + $0x68] sm:$0x33] %v589_v7  ;;  %530 = vst [vmem:[#allocation2 + $0x10] sm:$0xcc] %v500_v8  ;;  %v575_v11 = vrot.slane %v556_v9, 4  ;;  %v485_v12 = vrot.slane %v466_v10, 4 }
  0x99   : > { %v590_v13 = vsel %vm493_vm0, %v574_v1, %v575_v11  ;;  %v501_v14 = vsel %vm493_vm0, %v484_v2, %v485_v12 }
  0x9a   : > { %v591_v15 = vsel %vm584_vm2, %v554_v63, %v590_v13  ;;  %v502_v16 = vsel %vm495_vm1, %v464_v0, %v501_v14  ;;  %v558_v17 = vpop.permute.xlu1 %557  ;;  %v468_v18 = vpop.permute.xlu0 %467  ;;  %v5316_v22 = vld [vmem:[#allocation2 + $0x4] ss:$88 sps:$4 sm:$0x3f]  }
  0x9b   : > { %v5314_v19 = vld [vmem:[#allocation2 + $0x8] ss:$88 sps:$4 sm:$0x3f]   ;;  %620 = vst [vmem:[#allocation2 + $0x70] sm:$0x33] %v591_v15  ;;  %v576_v20 = vrot.slane %v558_v17, 4 }
  0x9c   : > { %531 = vst [vmem:[#allocation2 + $0x18] sm:$0xcc] %v502_v16  ;;  %v486_v21 = vrot.slane %v468_v18, 4  ;;  %4919 = vmatprep.subr.msk.bf16.mxu0 %vm755_vm3, %v5314_v19  ;;  %v757_v25 = vsel %vm755_vm3, %v5316_v22, 0 }
  0x9d   : > { %v592_v23 = vsel %vm493_vm0, %v575_v11, %v576_v20  ;;  %817 = vmatpush1.bf16.msra.mxu0 %v757_v25  ;;  %v5319_v35 = vld [vmem:[#allocation2 + $0xc] ss:$88 sps:$4 sm:$0x3f]  }
  0x9e   : > { %v503_v24 = vsel %vm493_vm0, %v485_v12, %v486_v21  ;;  %v593_v27 = vsel %vm584_vm2, %v556_v9, %v592_v23  ;;  %v560_v30 = vpop.permute.xlu1 %559  ;;  %v470_v31 = vpop.permute.xlu0 %469  ;;  %v5317_v32 = vld [vmem:[#allocation2 + $0x10] ss:$88 sps:$4 sm:$0x3f]   ;;  %v763_v38 = vsel %vm755_vm3, %v5319_v35, 0 }
  0x9f   : > { %v504_v29 = vsel %vm495_vm1, %v466_v10, %v503_v24  ;;  %621 = vst [vmem:[#allocation2 + $0x78] sm:$0x33] %v593_v27  ;;  %v577_v33 = vrot.slane %v560_v30, 4  ;;  %v487_v34 = vrot.slane %v470_v31, 4  ;;  %4921 = vmatprep.subr.msk.bf16.mxu1 %vm755_vm3, %v5317_v32 }
  0xa0   : > { %532 = vst [vmem:[#allocation2 + $0x20] sm:$0xcc] %v504_v29  ;;  %4920 = vmatmul.mubr.msk.bf16.vlgmr.msra.gmra.mrb[0].mxu0 %vm751_vm4, %v5584_v26  ;;  %858 = vmatpush1.bf16.msra.mxu1 %v763_v38  ;;  %v5322_v46 = vld [vmem:[#allocation2 + $0x14] ss:$88 sps:$4 sm:$0x3f]  }
  0xa1   : > { %v594_v36 = vsel %vm493_vm0, %v576_v20, %v577_v33  ;;  %v505_v37 = vsel %vm493_vm0, %v486_v21, %v487_v34  ;;  %930 = vmatprep.mubr.bf16.mxu0 %v5443_v28  ;;  %v769_v49 = vsel %vm755_vm3, %v5322_v46, 0  ;;  %v641_v46 = vld [vmem:[#allocation2 + $0x68] sm:$0x33] }
  0xa2   : > { %v595_v39 = vsel %vm584_vm2, %v558_v17, %v594_v36  ;;  %v506_v40 = vsel %vm495_vm1, %v468_v18, %v505_v37  ;;  %v562_v41 = vpop.permute.xlu1 %561  ;;  %v472_v42 = vpop.permute.xlu0 %471 }
  0xa3   : > { %v5320_v43 = vld [vmem:[#allocation2 + $0x18] ss:$88 sps:$4 sm:$0x3f]   ;;  %622 = vst [vmem:[#allocation2 + $0x80] sm:$0x33] %v595_v39  ;;  %v578_v44 = vrot.slane %v562_v41, 4  ;;  %4922 = vmatmul.mubr.msk.bf16.vlgmr.msra.gmra.mrb[0].mxu1 %vm751_vm4, %v5584_v26 }
  0xa4   : > { %533 = vst [vmem:[#allocation2 + $0x28] sm:$0xcc] %v506_v40  ;;  %v488_v45 = vrot.slane %v472_v42, 4  ;;  %4923 = vmatprep.subr.msk.bf16.mxu0 %vm755_vm3, %v5320_v43  ;;  %971 = vmatprep.mubr.bf16.mxu1 %v5443_v28  ;;  %v5325_v57 = vld [vmem:[#allocation2 + $0x1c] ss:$88 sps:$4 sm:$0x3f]  }
  0xa5   : > { %v596_v47 = vsel %vm493_vm0, %v577_v33, %v578_v44  ;;  %899 = vmatpush1.bf16.msra.mxu0 %v769_v49  ;;  %v775_v60 = vsel %vm755_vm3, %v5325_v57, 0  ;;  %v5647_v40 = vld [vmem:[#allocation2 + $0x8] sm:$0xff] }
  0xa6   : > { %v507_v48 = vsel %vm493_vm0, %v487_v34, %v488_v45  ;;  %v597_v50 = vsel %vm584_vm2, %v560_v30, %v596_v47  ;;  %v564_v52 = vpop.permute.xlu1 %563  ;;  %v474_v53 = vpop.permute.xlu0 %473 }
  0xa7   : > { %v508_v51 = vsel %vm495_vm1, %v470_v31, %v507_v48  ;;  %v5323_v54 = vld [vmem:[#allocation2 + $0x20] ss:$88 sps:$4 sm:$0x3f]   ;;  %623 = vst [vmem:[#allocation2 + $0x88] sm:$0x33] %v597_v50  ;;  %v579_v55 = vrot.slane %v564_v52, 4 }
  0xa8   : > { %534 = vst [vmem:[#allocation2 + $0x30] sm:$0xcc] %v508_v51  ;;  %v489_v56 = vrot.slane %v474_v53, 4  ;;  %4925 = vmatprep.subr.msk.bf16.mxu1 %vm755_vm3, %v5323_v54  ;;  %4924 = vmatmul.mubr.msk.bf16.vlgmr.msra.gmra.mrb[4].mxu0 %vm751_vm4, %v5584_v26  ;;  %v5328_v5 = vld [vmem:[#allocation2 + $0x24] ss:$88 sps:$4 sm:$0x3f]  }
  0xa9   : > { %v598_v58 = vsel %vm493_vm0, %v578_v44, %v579_v55  ;;  %940 = vmatpush1.bf16.msra.mxu1 %v775_v60  ;;  %1012 = vmatprep.mubr.bf16.mxu0 %v5443_v28  ;;  %v781_v8 = vsel %vm755_vm3, %v5328_v5, 0  ;;  %v640_v44 = vld [vmem:[#allocation2 + $0x60] sm:$0x33]  ;;  %v5665_v54 = vld [vmem:[#allocation2 + $0x18] sm:$0xff] }
  0xaa   : > { %v509_v59 = vsel %vm493_vm0, %v488_v45, %v489_v56  ;;  %v599_v61 = vsel %vm584_vm2, %v562_v41, %v598_v58  ;;  %v566_v63 = vpop.permute.xlu1 %565  ;;  %v476_v0 = vpop.permute.xlu0 %475  ;;  %v5341_v41 = vld [vmem:[#allocation2 + $0x4] ss:$88 sps:$4 sm:$0x3f]   ;;  %v5653_v45 = vld [vmem:[#allocation2 + $0x10] sm:$0xff]  ;;  %v4942_v49 = vcombine.high %v5647_v40, %v640_v44 }
  0xab   : > { %v510_v62 = vsel %vm495_vm1, %v472_v42, %v509_v59  ;;  %v5326_v1 = vld [vmem:[#allocation2 + $0x28] ss:$88 sps:$4 sm:$0x3f]   ;;  %624 = vst [vmem:[#allocation2 + $0x90] sm:$0x33] %v599_v61  ;;  %v580_v2 = vrot.slane %v566_v63, 4  ;;  %v4943_v58 = vcombine.low %v5653_v45, %v641_v46 }
  0xac   : > { %535 = vst [vmem:[#allocation2 + $0x38] sm:$0xcc] %v510_v62  ;;  %v490_v4 = vrot.slane %v476_v0, 4  ;;  %4927 = vmatprep.subr.msk.bf16.mxu0 %vm755_vm3, %v5326_v1  ;;  %4926 = vmatmul.mubr.msk.bf16.vlgmr.msra.gmra.mrb[4].mxu1 %vm751_vm4, %v5584_v26  ;;  %v5331_v16 = vld [vmem:[#allocation2 + $0x2c] ss:$88 sps:$4 sm:$0x3f]  }
  0xad   : > { %v600_v6 = vsel %vm493_vm0, %v579_v55, %v580_v2  ;;  %981 = vmatpush1.bf16.msra.mxu0 %v781_v8  ;;  %1053 = vmatprep.mubr.bf16.mxu1 %v5443_v28  ;;  %v787_v19 = vsel %vm755_vm3, %v5331_v16, 0  ;;  %v5346_v42 = vld [vmem:[#allocation2] ss:$88 sps:$4 sm:$0x3f]   ;;  %v642_v55 = vld [vmem:[#allocation2 + $0x70] sm:$0x33] }
  0xae   : > { %v511_v7 = vsel %vm493_vm0, %v489_v56, %v490_v4  ;;  %v601_v9 = vsel %vm584_vm2, %v564_v52, %v600_v6  ;;  %v568_v11 = vpop.permute.xlu1 %567  ;;  %v478_v12 = vpop.permute.xlu0 %477  ;;  %v1310_v51 = vsel %vm755_vm3, %v5346_v42, 0  ;;  %v4944_v52 = vcombine.high %v5653_v45, %v641_v46  ;;  %v5678_v59 = vld [vmem:[%s6601_s2] sm:$0xf]  ;;  %v643_v61 = vld [vmem:[#allocation2 + $0x78] sm:$0x33] }
  0xaf   : > { %v512_v10 = vsel %vm495_vm1, %v474_v53, %v511_v7  ;;  %v5329_v13 = vld [vmem:[#allocation2 + $0x30] ss:$88 sps:$4 sm:$0x3f]   ;;  %625 = vst [vmem:[#allocation2 + $0x98] sm:$0x33] %v601_v9  ;;  %v581_v14 = vrot.slane %v568_v11, 4  ;;  %v4941_v53 = vcombine.low %v5647_v40, %v640_v44  ;;  %v4946_v57 = vcombine.high %v5665_v54, %v642_v55 }
  0xb0   : > { %536 = vst [vmem:[#allocation2 + $0x40] sm:$0xcc] %v512_v10  ;;  %v491_v15 = vrot.slane %v478_v12, 4  ;;  %4929 = vmatprep.subr.msk.bf16.mxu1 %vm755_vm3, %v5329_v13  ;;  %4928 = vmatmul.mubr.msk.bf16.vlgmr.msra.gmra.mrb[8].mxu0 %vm751_vm4, %v5584_v26  ;;  %v5334_v29 = vld [vmem:[#allocation2 + $0x34] ss:$88 sps:$4 sm:$0x3f]  }
  0xb1   : > { %v602_v17 = vsel %vm493_vm0, %v580_v2, %v581_v14  ;;  %1022 = vmatpush1.bf16.msra.mxu1 %v787_v19  ;;  %1094 = vmatprep.mubr.bf16.mxu0 %v5443_v28  ;;  %v793_v32 = vsel %vm755_vm3, %v5334_v29, 0  ;;  %v1316_v56 = vsel %vm755_vm3, %v4941_v53, 0  ;;  %v5680_v60 = vld [vmem:[#allocation2 + $0x20] sm:$0xff]  ;;  %v5698_v6 = vld [vmem:[#allocation2 + $0x30] sm:$0xff]  ;;  %v645_v7 = vld [vmem:[#allocation2 + $0x88] sm:$0x33] }
  0xb2   : > { %v513_v18 = vsel %vm493_vm0, %v490_v4, %v491_v15  ;;  %v603_v20 = vsel %vm584_vm2, %v566_v63, %v602_v17  ;;  %v570_v22 = vpop.permute.xlu1 %569  ;;  %v480_v23 = vpop.permute.xlu0 %479  ;;  %v4948_v62 = vcombine.high %v5680_v60, %v643_v61  ;;  %v4945_v63 = vcombine.low %v5665_v54, %v642_v55  ;;  %v644_v1 = vld [vmem:[#allocation2 + $0x80] sm:$0x33]  ;;  %v4979_v44 = vld [vmem:[%s6601_s2 + $0x8] sm:$0xf]  ;;  %v1797_v53 = vld [vmem:[#allocation2 + $0x90] sm:$0x33] }
  0xb3   : > { %v514_v21 = vsel %vm495_vm1, %v476_v0, %v513_v18  ;;  %v5332_v24 = vld [vmem:[#allocation2 + $0x38] ss:$88 sps:$4 sm:$0x3f]   ;;  %626 = vst [vmem:[#allocation2 + $0xa0] sm:$0x33] %v603_v20  ;;  %v582_v25 = vrot.slane %v570_v22, 4  ;;  %v4947_v5 = vcombine.low %v5680_v60, %v643_v61  ;;  %v4952_v9 = vcombine.high %v5698_v6, %v645_v7 }
  0xb4   : > { %537 = vst [vmem:[#allocation2 + $0x48] sm:$0xcc] %v514_v21  ;;  %v492_v27 = vrot.slane %v480_v23, 4  ;;  %4931 = vmatprep.subr.msk.bf16.mxu0 %vm755_vm3, %v5332_v24  ;;  %4930 = vmatmul.mubr.msk.bf16.vlgmr.msra.gmra.mrb[8].mxu1 %vm751_vm4, %v5584_v26  ;;  %v5337_v36 = vld [vmem:[#allocation2 + $0x3c] ss:$88 sps:$4 sm:$0x3f]  }
  0xb5   : > { %v604_v30 = vsel %vm493_vm0, %v581_v14, %v582_v25  ;;  %1063 = vmatpush1.bf16.msra.mxu0 %v793_v32  ;;  %1135 = vmatprep.mubr.bf16.mxu1 %v5443_v28  ;;  %v799_v37 = vsel %vm755_vm3, %v5337_v36, 0  ;;  %v5689_v0 = vld [vmem:[#allocation2 + $0x28] sm:$0xff]  ;;  %v1328_v2 = vsel %vm755_vm3, %v4945_v63, 0  ;;  %v1334_v8 = vsel %vm755_vm3, %v4947_v5, 0  ;;  %v1793_v36 = vld [vmem:[#allocation2 + $0x70] sm:$0x33] }
  0xb6   : > { %v515_v31 = vsel %vm493_vm0, %v491_v15, %v492_v27  ;;  %v605_v33 = vsel %vm584_vm2, %v568_v11, %v604_v30  ;;  %v4950_v4 = vcombine.high %v5689_v0, %v644_v1  ;;  %v4949_v10 = vcombine.low %v5689_v0, %v644_v1  ;;  %v5707_v11 = vld [vmem:[#allocation2 + $0x38] sm:$0xff]  ;;  %v1791_v27 = vld [vmem:[#allocation2 + $0x60] sm:$0x33]  ;;  %v1792_v32 = vld [vmem:[#allocation2 + $0x68] sm:$0x33] }
  0xb7   : > { %v516_v34 = vsel %vm495_vm1, %v478_v12, %v515_v31  ;;  %v5335_v35 = vld [vmem:[#allocation2 + $0x40] ss:$88 sps:$4 sm:$0x3f]   ;;  %627 = vst [vmem:[#allocation2 + $0xa8] sm:$0x33] %v605_v33  ;;  %v4951_v15 = vcombine.low %v5698_v6, %v645_v7  ;;  %v4981_v30 = vcombine.high %v5647_v40, %v1791_v27  ;;  %v4993_v55 = vcombine.high %v5707_v11, %v1797_v53 }
  0xb8   : > { %538 = vst [vmem:[#allocation2 + $0x50] sm:$0xcc] %v516_v34  ;;  %4933 = vmatprep.subr.msk.bf16.mxu1 %vm755_vm3, %v5335_v35  ;;  %4932 = vmatmul.mubr.msk.bf16.vlgmr.msra.gmra.mrb[12].mxu0 %vm751_vm4, %v5584_v26  ;;  %v5340_v39 = vld [vmem:[#allocation2 + $0x44] ss:$88 sps:$4 sm:$0x3f]   ;;  %v1340_v13 = vsel %vm755_vm3, %v4949_v10, 0  ;;  %v4983_v34 = vcombine.high %v5653_v45, %v1792_v32  ;;  %v4980_v35 = vcombine.low %v5647_v40, %v1791_v27 }
  0xb9   : > { %1104 = vmatpush1.bf16.msra.mxu1 %v799_v37  ;;  %1176 = vmatprep.mubr.bf16.mxu0 %v5443_v28  ;;  %v805_v43 = vsel %vm755_vm3, %v5340_v39, 0  ;;  %v646_v12 = vld [vmem:[#allocation2 + $0x90] sm:$0x33]  ;;  %v5716_v16 = vld [vmem:[#allocation2 + $0x40] sm:$0xff]  ;;  %v647_v17 = vld [vmem:[#allocation2 + $0x98] sm:$0x33]  ;;  %v4982_v39 = vcombine.low %v5653_v45, %v1792_v32 }
  0xba   : > { %v4954_v14 = vcombine.high %v5707_v11, %v646_v12  ;;  %v1346_v18 = vsel %vm755_vm3, %v4951_v15, 0  ;;  %v4956_v19 = vcombine.high %v5716_v16, %v647_v17  ;;  %v4953_v20 = vcombine.low %v5707_v11, %v646_v12  ;;  %v648_v22 = vld [vmem:[#allocation2 + $0xa0] sm:$0x33] }
  0xbb   : > { %v5338_v38 = vld [vmem:[#allocation2 + $0x48] ss:$88 sps:$4 sm:$0x3f]   ;;  %v5345_v48 = vld [vmem:[#allocation2 + $0x4c] ss:$88 sps:$4 sm:$0x3f]   ;;  %v4955_v25 = vcombine.low %v5716_v16, %v647_v17 }
  0xbc   : > { %4935 = vmatprep.subr.msk.bf16.mxu0 %vm755_vm3, %v5338_v38  ;;  %4934 = vmatmul.mubr.msk.bf16.vlgmr.msra.gmra.mrb[12].mxu1 %vm751_vm4, %v5584_v26  ;;  %v811_v50 = vsel %vm755_vm3, %v5345_v48, 0  ;;  %v5725_v21 = vld [vmem:[#allocation2 + $0x48] sm:$0xff]  ;;  %v1352_v23 = vsel %vm755_vm3, %v4953_v20, 0  ;;  %v1885_v37 = vsel %vm755_vm3, %v4980_v35, 0  ;;  %v4985_v38 = vcombine.high %v5665_v54, %v1793_v36  ;;  %v1795_v45 = vld [vmem:[#allocation2 + $0x80] sm:$0x33] }
  0xbd   : > { %1145 = vmatpush1.bf16.msra.mxu0 %v805_v43  ;;  %1217 = vmatprep.mubr.bf16.mxu1 %v5443_v28  ;;  %v4958_v24 = vcombine.high %v5725_v21, %v648_v22  ;;  %v1358_v29 = vsel %vm755_vm3, %v4955_v25, 0  ;;  %v4957_v31 = vcombine.low %v5725_v21, %v648_v22  ;;  %v1891_v40 = vsel %vm755_vm3, %v4982_v39, 0  ;;  %v1799_v61 = vld [vmem:[#allocation2 + $0xa0] sm:$0x33] }
  0xbe   : > { %4959 = vmatprep.subr.msk.bf16.mxu0 %vm755_vm3, %v5341_v41  ;;  %v1794_v41 = vld [vmem:[#allocation2 + $0x78] sm:$0x33]  ;;  %v4984_v43 = vcombine.low %v5665_v54, %v1793_v36 }
  0xbf   : > { %v5343_v47 = vld [vmem:[#allocation2 + $0x50] ss:$88 sps:$4 sm:$0x3f]   ;;  %v1364_v33 = vsel %vm755_vm3, %v4957_v31, 0  ;;  %v4987_v42 = vcombine.high %v5680_v60, %v1794_v41  ;;  %v4986_v48 = vcombine.low %v5680_v60, %v1794_v41  ;;  %v4992_v60 = vcombine.low %v5707_v11, %v1797_v53 }
  0xc0   : > { %4937 = vmatprep.subr.msk.bf16.mxu1 %vm755_vm3, %v5343_v47  ;;  %4936 = vmatmul.mubr.msk.bf16.vlgmr.msra.gmra.mrb[16].mxu0 %vm751_vm4, %v5584_v26  ;;  %v1897_v46 = vsel %vm755_vm3, %v4984_v43, 0  ;;  %v4989_v47 = vcombine.high %v5689_v0, %v1795_v45  ;;  %v5382_v1 = vld [vmem:[#allocation2 + $0x54] ss:$88 sps:$4 sm:$0x3f]  }
  0xc1   : > { %1186 = vmatpush1.bf16.msra.mxu1 %v811_v50  ;;  %1370 = vmatpush1.bf16.msra.mxu0 %v1310_v51  ;;  %v1903_v50 = vsel %vm755_vm3, %v4986_v48, 0  ;;  %v5385_v5 = vld [vmem:[#allocation2 + $0x50] ss:$88 sps:$4 sm:$0x3f]  }
  0xc2   : > { %4961 = vmatprep.subr.msk.bf16.mxu1 %vm755_vm3, %v4942_v49  ;;  %4963 = vmatprep.subr.msk.bf16.mxu0 %vm755_vm3, %v4944_v52  ;;  %v1796_v49 = vld [vmem:[#allocation2 + $0x88] sm:$0x33]  ;;  %v4988_v52 = vcombine.low %v5689_v0, %v1795_v45 }
  0xc3   : > { %1401 = vmatprep.mubr.bf16.mxu0 %v5443_v28  ;;  %v4991_v51 = vcombine.high %v5698_v6, %v1796_v49 }
  0xc4   : > { %4938 = vmatmul.mubr.msk.bf16.vlgmr.msra.gmra.mrb[16].mxu1 %vm751_vm4, %v5584_v26  ;;  %v1322_v26 = vsel %vm755_vm3, %v4943_v58, 0  ;;  %v1909_v54 = vsel %vm755_vm3, %v4988_v52, 0 }
  0xc5   : > { %1411 = vmatpush1.bf16.msra.mxu1 %v1316_v56  ;;  %1442 = vmatprep.mubr.bf16.mxu1 %v5443_v28  ;;  %v4990_v56 = vcombine.low %v5698_v6, %v1796_v49  ;;  %v1939_v6 = vsel %vm755_vm3, %v5385_v5, 0 }
  0xc6   : > { %4965 = vmatprep.subr.msk.bf16.mxu1 %vm755_vm3, %v4946_v57  ;;  %v1798_v57 = vld [vmem:[#allocation2 + $0x98] sm:$0x33] }
  0xc7   : > { %v1915_v58 = vsel %vm755_vm3, %v4990_v56, 0  ;;  %v4994_v63 = vcombine.low %v5716_v16, %v1798_v57 }
  0xc8   : > { %4960 = vmatmul.mubr.msk.bf16.vlgmr.msra.gmra.mrb[20].mxu0 %vm751_vm4, %v5678_v59 }
  0xc9   : > { %1452 = vmatpush1.bf16.msra.mxu0 %v1322_v26  ;;  %1483 = vmatprep.mubr.bf16.mxu0 %v5443_v28  ;;  %v1921_v26 = vsel %vm755_vm3, %v4992_v60, 0  ;;  %v1927_v0 = vsel %vm755_vm3, %v4994_v63, 0 }
  0xca   : > { %4967 = vmatprep.subr.msk.bf16.mxu0 %vm755_vm3, %v4948_v62  ;;  %v4997_v62 = vcombine.high %v5725_v21, %v1799_v61 }
  0xcc   : > { %4962 = vmatmul.mubr.msk.bf16.vlgmr.msra.gmra.mrb[20].mxu1 %vm751_vm4, %v5678_v59 }
  0xcd   : > { %1493 = vmatpush1.bf16.msra.mxu1 %v1328_v2  ;;  %1524 = vmatprep.mubr.bf16.mxu1 %v5443_v28  ;;  %v4996_v2 = vcombine.low %v5725_v21, %v1799_v61 }
  0xce   : > { %4969 = vmatprep.subr.msk.bf16.mxu1 %vm755_vm3, %v4950_v4 }
  0xcf   : > { %v1933_v4 = vsel %vm755_vm3, %v4996_v2, 0 }
  0xd0   : > { %4964 = vmatmul.mubr.msk.bf16.vlgmr.msra.gmra.mrb[24].mxu0 %vm751_vm4, %v5678_v59 }
  0xd1   : > { %1534 = vmatpush1.bf16.msra.mxu0 %v1334_v8  ;;  %1565 = vmatprep.mubr.bf16.mxu0 %v5443_v28 }
  0xd2   : > { %4971 = vmatprep.subr.msk.bf16.mxu0 %vm755_vm3, %v4952_v9 }
  0xd4   : > { %4966 = vmatmul.mubr.msk.bf16.vlgmr.msra.gmra.mrb[24].mxu1 %vm751_vm4, %v5678_v59 }
  0xd5   : > { %1575 = vmatpush1.bf16.msra.mxu1 %v1340_v13  ;;  %1606 = vmatprep.mubr.bf16.mxu1 %v5443_v28 }
  0xd6   : > { %4973 = vmatprep.subr.msk.bf16.mxu1 %vm755_vm3, %v4954_v14 }
  0xd8   : > { %4968 = vmatmul.mubr.msk.bf16.vlgmr.msra.gmra.mrb[28].mxu0 %vm751_vm4, %v5678_v59 }
  0xd9   : > { %1616 = vmatpush1.bf16.msra.mxu0 %v1346_v18  ;;  %1647 = vmatprep.mubr.bf16.mxu0 %v5443_v28 }
  0xda   : > { %4975 = vmatprep.subr.msk.bf16.mxu0 %vm755_vm3, %v4956_v19 }
  0xdc   : > { %4970 = vmatmul.mubr.msk.bf16.vlgmr.msra.gmra.mrb[28].mxu1 %vm751_vm4, %v5678_v59 }
  0xdd   : > { %1657 = vmatpush1.bf16.msra.mxu1 %v1352_v23  ;;  %1688 = vmatprep.mubr.bf16.mxu1 %v5443_v28 }
  0xde   : > { %4977 = vmatprep.subr.msk.bf16.mxu1 %vm755_vm3, %v4958_v24 }
  0xe0   : > { %4972 = vmatmul.mubr.msk.bf16.vlgmr.msra.gmra.mrb[32].mxu0 %vm751_vm4, %v5678_v59 }
  0xe1   : > { %1698 = vmatpush1.bf16.msra.mxu0 %v1358_v29  ;;  %1729 = vmatprep.mubr.bf16.mxu0 %v5443_v28 }
  0xe2   : > { %5000 = vmatprep.subr.msk.bf16.mxu0 %vm755_vm3, %v4981_v30 }
  0xe4   : > { %4974 = vmatmul.mubr.msk.bf16.vlgmr.msra.gmra.mrb[32].mxu1 %vm751_vm4, %v5678_v59 }
  0xe5   : > { %1739 = vmatpush1.bf16.msra.mxu1 %v1364_v33  ;;  %1770 = vmatprep.mubr.bf16.mxu1 %v5443_v28 }
  0xe6   : > { %5002 = vmatprep.subr.msk.bf16.mxu1 %vm755_vm3, %v4983_v34 }
  0xe8   : > { %4976 = vmatmul.mubr.msk.bf16.vlgmr.msra.gmra.mrb[36].mxu0 %vm751_vm4, %v5678_v59 }
  0xe9   : > { %1945 = vmatpush1.bf16.msra.mxu0 %v1885_v37  ;;  %1976 = vmatprep.mubr.bf16.mxu0 %v5443_v28 }
  0xea   : > { %5004 = vmatprep.subr.msk.bf16.mxu0 %vm755_vm3, %v4985_v38 }
  0xec   : > { %4978 = vmatmul.mubr.msk.bf16.vlgmr.msra.gmra.mrb[36].mxu1 %vm751_vm4, %v5678_v59  ;;  %v4995_v59 = vcombine.high %v5716_v16, %v1798_v57 }
  0xed   : > { %1986 = vmatpush1.bf16.msra.mxu1 %v1891_v40  ;;  %2017 = vmatprep.mubr.bf16.mxu1 %v5443_v28 }
  0xee   : > { %5006 = vmatprep.subr.msk.bf16.mxu1 %vm755_vm3, %v4987_v42 }
  0xf0   : > { %5001 = vmatmul.mubr.msk.bf16.vlgmr.msra.gmra.mrb[40].mxu0 %vm751_vm4, %v4979_v44 }
  0xf1   : > { %2027 = vmatpush1.bf16.msra.mxu0 %v1897_v46  ;;  %2058 = vmatprep.mubr.bf16.mxu0 %v5443_v28 }
  0xf2   : > { %5008 = vmatprep.subr.msk.bf16.mxu0 %vm755_vm3, %v4989_v47 }
  0xf4   : > { %5003 = vmatmul.mubr.msk.bf16.vlgmr.msra.gmra.mrb[40].mxu1 %vm751_vm4, %v4979_v44 }
  0xf5   : > { %2068 = vmatpush1.bf16.msra.mxu1 %v1903_v50  ;;  %2099 = vmatprep.mubr.bf16.mxu1 %v5443_v28 }
  0xf6   : > { %5010 = vmatprep.subr.msk.bf16.mxu1 %vm755_vm3, %v4991_v51 }
  0xf8   : > { %5005 = vmatmul.mubr.msk.bf16.vlgmr.msra.gmra.mrb[44].mxu0 %vm751_vm4, %v4979_v44 }
  0xf9   : > { %2109 = vmatpush1.bf16.msra.mxu0 %v1909_v54  ;;  %2140 = vmatprep.mubr.bf16.mxu0 %v5443_v28 }
  0xfa   : > { %5012 = vmatprep.subr.msk.bf16.mxu0 %vm755_vm3, %v4993_v55 }
  0xfc   : > { %5007 = vmatmul.mubr.msk.bf16.vlgmr.msra.gmra.mrb[44].mxu1 %vm751_vm4, %v4979_v44 }
  0xfd   : > { %2150 = vmatpush1.bf16.msra.mxu1 %v1915_v58  ;;  %2181 = vmatprep.mubr.bf16.mxu1 %v5443_v28 }
  0xfe   : > { %5014 = vmatprep.subr.msk.bf16.mxu1 %vm755_vm3, %v4995_v59 }
 0x100   : > { %5009 = vmatmul.mubr.msk.bf16.vlgmr.msra.gmra.mrb[48].mxu0 %vm751_vm4, %v4979_v44 }
 0x101   : > { %2191 = vmatpush1.bf16.msra.mxu0 %v1921_v26  ;;  %2222 = vmatprep.mubr.bf16.mxu0 %v5443_v28 }
 0x102   : > { %5016 = vmatprep.subr.msk.bf16.mxu0 %vm755_vm3, %v4997_v62 }
 0x104   : > { %5011 = vmatmul.mubr.msk.bf16.vlgmr.msra.gmra.mrb[48].mxu1 %vm751_vm4, %v4979_v44 }
 0x105   : > { %2232 = vmatpush1.bf16.msra.mxu1 %v1927_v0  ;;  %2263 = vmatprep.mubr.bf16.mxu1 %v5443_v28 }
 0x106   : > { %5018 = vmatprep.subr.msk.bf16.mxu1 %vm755_vm3, %v5382_v1 }
 0x108   : > { %5013 = vmatmul.mubr.msk.bf16.vlgmr.msra.gmra.mrb[52].mxu0 %vm751_vm4, %v4979_v44 }
 0x109   : > { %2273 = vmatpush1.bf16.msra.mxu0 %v1933_v4  ;;  %2304 = vmatprep.mubr.bf16.mxu0 %v5443_v28 }
 0x10c   : > { %5015 = vmatmul.mubr.msk.bf16.vlgmr.msra.gmra.mrb[52].mxu1 %vm751_vm4, %v4979_v44 }
 0x10d   : > { %2314 = vmatpush1.bf16.msra.mxu1 %v1939_v6  ;;  %2345 = vmatprep.mubr.bf16.mxu1 %v5443_v28 }
 0x110   : > { %5017 = vmatmul.mubr.msk.bf16.vlgmr.msra.gmra.mrb[56].mxu0 %vm751_vm4, %v4979_v44 }
 0x111   : > { %3049 = vmatprep.mubr.bf16.mxu0 %v5443_v28 }
 0x114   : > { %5019 = vmatmul.mubr.msk.bf16.vlgmr.msra.gmra.mrb[56].mxu1 %vm751_vm4, %v4979_v44 }
 0x115   : > { %3090 = vmatprep.mubr.bf16.mxu1 %v5443_v28 }
 0x173   : > { %v850_v7 = vpop.f32.mrb[0].mxu0 }
 0x174   : > { %v852_v8 = vpop.f32.mrb[1].mxu0 }
 0x175   : > { %v854_v9 = vpop.f32.mrb[2].mxu0 }
 0x176   : > { %v855_v10 = vpop.f32.mrb[3].mxu0  ;;  %v891_v11 = vpop.f32.mrb[0].mxu1 }
 0x177   : > { %v893_v12 = vpop.f32.mrb[1].mxu1 }
 0x178   : > { %v895_v13 = vpop.f32.mrb[2].mxu1 }
 0x179   : > { %v896_v14 = vpop.f32.mrb[3].mxu1 }
 0x17b   : > { %v932_v15 = vpop.f32.mrb[4].mxu0 }
 0x17c   : > { %v934_v16 = vpop.f32.mrb[5].mxu0 }
 0x17d   : > { %v936_v17 = vpop.f32.mrb[6].mxu0 }
 0x17e   : > { %v937_v18 = vpop.f32.mrb[7].mxu0 }
 0x17f   : > { %v973_v19 = vpop.f32.mrb[4].mxu1 }
 0x180   : > { %v975_v20 = vpop.f32.mrb[5].mxu1 }
 0x181   : > { %v977_v21 = vpop.f32.mrb[6].mxu1 }
 0x182   : > { %v978_v22 = vpop.f32.mrb[7].mxu1 }
 0x183   : > { %v1014_v23 = vpop.f32.mrb[8].mxu0 }
 0x184   : > { %v1016_v24 = vpop.f32.mrb[9].mxu0 }
 0x185   : > { %v1018_v25 = vpop.f32.mrb[10].mxu0 }
 0x186   : > { %v1019_v27 = vpop.f32.mrb[11].mxu0 }
 0x187   : > { %v1055_v29 = vpop.f32.mrb[8].mxu1 }
 0x188   : > { %v1057_v30 = vpop.f32.mrb[9].mxu1 }
 0x189   : > { %v1059_v31 = vpop.f32.mrb[10].mxu1 }
 0x18a   : > { %v1060_v32 = vpop.f32.mrb[11].mxu1 }
 0x18b   : > { %v1096_v33 = vpop.f32.mrb[12].mxu0 }
 0x18c   : > { %v1098_v34 = vpop.f32.mrb[13].mxu0 }
 0x18d   : > { %v1100_v35 = vpop.f32.mrb[14].mxu0 }
 0x18e   : > { %v1101_v36 = vpop.f32.mrb[15].mxu0 }
 0x18f   : > { %v1137_v37 = vpop.f32.mrb[12].mxu1 }
 0x190   : > { %v1139_v38 = vpop.f32.mrb[13].mxu1 }
 0x191   : > { %v1141_v39 = vpop.f32.mrb[14].mxu1 }
 0x192   : > { %v1142_v41 = vpop.f32.mrb[15].mxu1 }
 0x193   : > { %v1178_v40 = vpop.f32.mrb[16].mxu0 }
 0x194   : > { %v1180_v42 = vpop.f32.mrb[17].mxu0 }
 0x195   : > { %v1182_v43 = vpop.f32.mrb[18].mxu0 }
 0x196   : > { %v1183_v44 = vpop.f32.mrb[19].mxu0 }
 0x197   : > { %v1219_v45 = vpop.f32.mrb[16].mxu1 }
 0x198   : > { %v1221_v46 = vpop.f32.mrb[17].mxu1 }
 0x199   : > { %v1223_v47 = vpop.f32.mrb[18].mxu1 }
 0x19a   : > { %v1224_v48 = vpop.f32.mrb[19].mxu1 }
 0x19b   : > { %v1403_v49 = vpop.f32.mrb[20].mxu0 }
 0x19c   : > { %v5812_v50 = vadd.f32 %v1403_v49, %v850_v7  ;;  %v1405_v51 = vpop.f32.mrb[21].mxu0 }
 0x19d   : > { %v5814_v52 = vadd.f32 %v1405_v51, %v852_v8  ;;  %v1407_v53 = vpop.f32.mrb[22].mxu0 }
 0x19e   : > { %v1408_v54 = vpop.f32.mrb[23].mxu0 }
 0x19f   : > { %v1444_v55 = vpop.f32.mrb[20].mxu1 }
 0x1a0   : > { %v5816_v56 = vadd.f32 %v1444_v55, %v891_v11  ;;  %v1446_v57 = vpop.f32.mrb[21].mxu1  ;;  %v5855_v55 = vpop.permute.xlu0 %2377 }
 0x1a1   : > { %v5818_v58 = vadd.f32 %v1446_v57, %v893_v12  ;;  %v1448_v59 = vpop.f32.mrb[22].mxu1 }
 0x1a2   : > { %v1449_v60 = vpop.f32.mrb[23].mxu1 }
 0x1a3   : > { %v1485_v61 = vpop.f32.mrb[24].mxu0 }
 0x1a4   : > { %v5820_v26 = vadd.f32 %v1485_v61, %v932_v15  ;;  %v1487_v62 = vpop.f32.mrb[25].mxu0  ;;  %v5866_v61 = vsub.s32 2, %v5496_v3 }
 0x1a5   : > { %v5822_v63 = vadd.f32 %v1487_v62, %v934_v16  ;;  %v1489_v0 = vpop.f32.mrb[26].mxu0 }
 0x1a6   : > { %v1490_v1 = vpop.f32.mrb[27].mxu0 }
 0x1a7   : > { %v1526_v2 = vpop.f32.mrb[24].mxu1 }
 0x1a8   : > { %v5824_v4 = vadd.f32 %v1526_v2, %v973_v19  ;;  %v1528_v5 = vpop.f32.mrb[25].mxu1  ;;  %v5871_v2 = vsub.s32 3, %v5496_v3 }
 0x1a9   : > { %v5826_v6 = vadd.f32 %v1528_v5, %v975_v20  ;;  %v1530_v7 = vpop.f32.mrb[26].mxu1 }
 0x1aa   : > { %v1531_v8 = vpop.f32.mrb[27].mxu1 }
 0x1ab   : > { %v1567_v9 = vpop.f32.mrb[28].mxu0 }
 0x1ac   : > { %v5828_v10 = vadd.f32 %v1567_v9, %v1014_v23  ;;  %v1569_v11 = vpop.f32.mrb[29].mxu0 }
 0x1ad   : > { %v5830_v12 = vadd.f32 %v1569_v11, %v1016_v24  ;;  %v1571_v13 = vpop.f32.mrb[30].mxu0 }
 0x1ae   : > { %v1572_v14 = vpop.f32.mrb[31].mxu0 }
 0x1af   : > { %v1608_v15 = vpop.f32.mrb[28].mxu1 }
 0x1b0   : > { %v5832_v16 = vadd.f32 %v1608_v15, %v1055_v29  ;;  %v1610_v17 = vpop.f32.mrb[29].mxu1 }
 0x1b1   : > { %v5834_v18 = vadd.f32 %v1610_v17, %v1057_v30  ;;  %v1612_v19 = vpop.f32.mrb[30].mxu1  ;;  %v2444_v17 = vsub.s32 4, %v5496_v3 }
 0x1b2   : > { %v1613_v21 = vpop.f32.mrb[31].mxu1 }
 0x1b3   : > { %v1649_v20 = vpop.f32.mrb[32].mxu0 }
 0x1b4   : > { %v5836_v22 = vadd.f32 %v1649_v20, %v1096_v33  ;;  %v1651_v25 = vpop.f32.mrb[33].mxu0 }
 0x1b5   : > { %v5838_v27 = vadd.f32 %v1651_v25, %v1098_v34  ;;  %v1653_v23 = vpop.f32.mrb[34].mxu0 }
 0x1b6   : > { %v1654_v31 = vpop.f32.mrb[35].mxu0 }
 0x1b7   : > { %v1690_v24 = vpop.f32.mrb[32].mxu1 }
 0x1b8   : > { %v5840_v32 = vadd.f32 %v1690_v24, %v1137_v37  ;;  %v1692_v35 = vpop.f32.mrb[33].mxu1 }
 0x1b9   : > { %v5842_v36 = vadd.f32 %v1692_v35, %v1139_v38  ;;  %v1694_v29 = vpop.f32.mrb[34].mxu1  ;;  %v5853_v38 = vsub.s32 0, %v5496_v3 }
 0x1ba   : > { %v1695_v39 = vpop.f32.mrb[35].mxu1 }
 0x1bb   : > { %v1731_v30 = vpop.f32.mrb[36].mxu0 }
 0x1bc   : > { %v5844_v41 = vadd.f32 %v1731_v30, %v1178_v40  ;;  %v1733_v43 = vpop.f32.mrb[37].mxu0  ;;  %v2420_v40 = vld [vmem:[%s6600_s1] sm:$0xff] }
 0x1bd   : > { %v5846_v44 = vadd.f32 %v1733_v43, %v1180_v42  ;;  %v1735_v33 = vpop.f32.mrb[38].mxu0  ;;  %v5861_v42 = vsub.s32 1, %v5496_v3  ;;  %v2429_v0 = vrot.slane %v2420_v40, %v5853_v38  ;;  %v2437_v15 = vrot.slane %v2420_v40, %v5866_v61 }
 0x1be   : > { %v1736_v47 = vpop.f32.mrb[39].mxu0  ;;  %v2441_v25 = vrot.slane %v2420_v40, %v5871_v2 }
 0x1bf   : > { %v1772_v34 = vpop.f32.mrb[36].mxu1 }
 0x1c0   : > { %v5848_v48 = vadd.f32 %v1772_v34, %v1219_v45  ;;  %v1774_v49 = vpop.f32.mrb[37].mxu1  ;;  %v2445_v34 = vrot.slane %v2420_v40, %v2444_v17 }
 0x1c1   : > { %v5850_v51 = vadd.f32 %v1774_v49, %v1221_v46  ;;  %v1776_v37 = vpop.f32.mrb[38].mxu1 }
 0x1c2   : > { %v1777_v53 = vpop.f32.mrb[39].mxu1  ;;  %v2452_v37 = vsub.s32 6, %v5496_v3 }
 0x1c3   : > { %v1978_v54 = vpop.f32.mrb[40].mxu0 }
 0x1c4   : > { %v2354_v45 = vadd.f32 %v1978_v54, %v5812_v50  ;;  %v1980_v57 = vpop.f32.mrb[41].mxu0  ;;  %v2433_v50 = vrot.slane %v2420_v40, %v5861_v42 }
 0x1c5   : > { %v2355_v46 = vadd.f32 %v1980_v57, %v5814_v52  ;;  %v1982_v59 = vpop.f32.mrb[42].mxu0 }
 0x1c6   : > { %v1983_v60 = vpop.f32.mrb[43].mxu0  ;;  %v2380_v62 = vadd.f32 %v5855_v55, %v2354_v45 }
 0x1c7   : > { %v2019_v1 = vpop.f32.mrb[40].mxu1  ;;  %v2381_v5 = vadd.f32 %v5855_v55, %v2355_v46 }
 0x1c8   : > { %v2356_v7 = vadd.f32 %v2019_v1, %v5816_v56  ;;  %v2021_v52 = vpop.f32.mrb[41].mxu1  ;;  %v2400_v8 = vmax.f32 %v2380_v62, 0.0  ;;  %v2448_v56 = vsub.s32 5, %v5496_v3 }
 0x1c9   : > { %v2357_v9 = vadd.f32 %v2021_v52, %v5818_v58  ;;  %v2023_v11 = vpop.f32.mrb[42].mxu1  ;;  %v2401_v13 = vmax.f32 %v2381_v5, 0.0 }
 0x1ca   : > { %v2382_v14 = vadd.f32 %v5855_v55, %v2356_v7  ;;  %v2024_v19 = vpop.f32.mrb[43].mxu1  ;;  %v2526_v21 = vmul.f32 %v2429_v0, %v2400_v8  ;;  %v2453_v7 = vrot.slane %v2420_v40, %v2452_v37 }
 0x1cb   : > { %v2383_v20 = vadd.f32 %v5855_v55, %v2357_v9  ;;  %v2060_v23 = vpop.f32.mrb[44].mxu0  ;;  %v2527_v31 = vmul.f32 %v2433_v50, %v2401_v13 }
 0x1cc   : > { %v2402_v24 = vmax.f32 %v2382_v14, 0.0  ;;  %v2358_v58 = vadd.f32 %v2060_v23, %v5820_v26  ;;  %v2062_v35 = vpop.f32.mrb[45].mxu0  ;;  %v2449_v26 = vrot.slane %v2420_v40, %v2448_v56 }
 0x1cd   : > { %v2403_v29 = vmax.f32 %v2383_v20, 0.0  ;;  %v2359_v39 = vadd.f32 %v2062_v35, %v5822_v63  ;;  %v2064_v30 = vpop.f32.mrb[46].mxu0  ;;  %v5885_v43 = vpack.c.bf16 %v2527_v31, %v2526_v21  ;;  %v2456_v63 = vsub.s32 7, %v5496_v3 }
 0x1ce   : > { %v2528_v33 = vmul.f32 %v2437_v15, %v2402_v24  ;;  %v2384_v47 = vadd.f32 %v5855_v55, %v2358_v58  ;;  %v2065_v49 = vpop.f32.mrb[47].mxu0 }
 0x1cf   : > { %v2529_v53 = vmul.f32 %v2441_v25, %v2403_v29  ;;  %v2385_v54 = vadd.f32 %v5855_v55, %v2359_v39  ;;  %v2101_v45 = vpop.f32.mrb[44].mxu1  ;;  %2637 = vrot.lane.b32.xlu1 %v5885_v43, %s5442_s8  ;;  %2624 = vst [vmem:[#allocation2] sm:$0xff] %v5885_v43 }
 0x1d0   : > { %v2404_v57 = vmax.f32 %v2384_v47, 0.0  ;;  %v2360_v46 = vadd.f32 %v2101_v45, %v5824_v4  ;;  %v2103_v59 = vpop.f32.mrb[45].mxu1  ;;  %v2457_v4 = vrot.slane %v2420_v40, %v2456_v63 }
 0x1d1   : > { %v2405_v60 = vmax.f32 %v2385_v54, 0.0  ;;  %v2361_v62 = vadd.f32 %v2103_v59, %v5826_v6  ;;  %v5900_v0 = vpack.c.bf16 %v2529_v53, %v2528_v33  ;;  %v2105_v1 = vpop.f32.mrb[46].mxu1  ;;  %v5911_v6 = vld [vmem:[%s6600_s1 + $0x8] sm:$0xff] }
 0x1d2   : > { %v2530_v5 = vmul.f32 %v2445_v34, %v2404_v57  ;;  %v2386_v50 = vadd.f32 %v5855_v55, %v2360_v46  ;;  %v2106_v52 = vpop.f32.mrb[47].mxu1  ;;  %v2461_v31 = vrot.slane %v5911_v6, %v5853_v38 }
 0x1d3   : > { %v2531_v8 = vmul.f32 %v2449_v26, %v2405_v60  ;;  %v2387_v9 = vadd.f32 %v5855_v55, %v2361_v62  ;;  %v2142_v11 = vpop.f32.mrb[48].mxu0  ;;  %2625 = vst [vmem:[#allocation2 + $0x8] sm:$0xff] %v5900_v0  ;;  %2639 = vrot.lane.b32.xlu1 %v5900_v0, %s5442_s8  ;;  %v2469_v26 = vrot.slane %v5911_v6, %v5866_v61 }
 0x1d4   : > { %v2406_v13 = vmax.f32 %v2386_v50, 0.0  ;;  %v2362_v14 = vadd.f32 %v2142_v11, %v5828_v10  ;;  %v2144_v15 = vpop.f32.mrb[49].mxu0  ;;  %v2465_v10 = vrot.slane %v5911_v6, %v5861_v42 }
 0x1d5   : > { %v2407_v19 = vmax.f32 %v2387_v9, 0.0  ;;  %v2363_v21 = vadd.f32 %v2144_v15, %v5830_v12  ;;  %v5918_v20 = vpack.c.bf16 %v2531_v8, %v2530_v5  ;;  %v2146_v40 = vpop.f32.mrb[50].mxu0  ;;  %v2477_v9 = vrot.slane %v5911_v6, %v2444_v17 }
 0x1d6   : > { %v2532_v25 = vmul.f32 %v2453_v7, %v2406_v13  ;;  %v2388_v23 = vadd.f32 %v5855_v55, %v2362_v14  ;;  %v2147_v24 = vpop.f32.mrb[51].mxu0 }
 0x1d7   : > { %v2533_v58 = vmul.f32 %v2457_v4, %v2407_v19  ;;  %v2389_v35 = vadd.f32 %v5855_v55, %v2363_v21  ;;  %v2183_v29 = vpop.f32.mrb[48].mxu1  ;;  %2641 = vrot.lane.b32.xlu0 %v5918_v20, %s5442_s8  ;;  %2626 = vst [vmem:[#allocation2 + $0x10] sm:$0xff] %v5918_v20  ;;  %2706 = vrot.lane.b32.xlu1 %v5885_v43, %s5441_s30 }
 0x1d8   : > { %v2408_v12 = vmax.f32 %v2388_v23, 0.0  ;;  %v2364_v39 = vadd.f32 %v2183_v29, %v5832_v16  ;;  %v2185_v30 = vpop.f32.mrb[49].mxu1  ;;  %v2473_v16 = vrot.slane %v5911_v6, %v5871_v2 }
 0x1d9   : > { %v2409_v33 = vmax.f32 %v2389_v35, 0.0  ;;  %v2365_v47 = vadd.f32 %v2185_v30, %v5834_v18  ;;  %v2187_v34 = vpop.f32.mrb[50].mxu1  ;;  %v5933_v49 = vpack.c.bf16 %v2533_v58, %v2532_v25 }
 0x1da   : > { %v2534_v53 = vmul.f32 %v2461_v31, %v2408_v12  ;;  %v2390_v54 = vadd.f32 %v5855_v55, %v2364_v39  ;;  %v2188_v45 = vpop.f32.mrb[51].mxu1  ;;  %v2485_v31 = vrot.slane %v5911_v6, %v2452_v37 }
 0x1db   : > { %v2535_v57 = vmul.f32 %v2465_v10, %v2409_v33  ;;  %v2391_v46 = vadd.f32 %v5855_v55, %v2365_v47  ;;  %v2224_v59 = vpop.f32.mrb[52].mxu0  ;;  %2708 = vrot.lane.b32.xlu0 %v5900_v0, %s5441_s30  ;;  %2710 = vrot.lane.b32.xlu1 %v5918_v20, %s5441_s30  ;;  %2627 = vst [vmem:[#allocation2 + $0x18] sm:$0xff] %v5933_v49 }
 0x1dc   : > { %v2410_v18 = vmax.f32 %v2390_v54, 0.0  ;;  %v2366_v60 = vadd.f32 %v2224_v59, %v5836_v22  ;;  %v2226_v62 = vpop.f32.mrb[53].mxu0  ;;  %v2481_v22 = vrot.slane %v5911_v6, %v2448_v56 }
 0x1dd   : > { %v2411_v1 = vmax.f32 %v2391_v46, 0.0  ;;  %v2367_v5 = vadd.f32 %v2226_v62, %v5838_v27  ;;  %v5948_v50 = vpack.c.bf16 %v2535_v57, %v2534_v53  ;;  %v2228_v7 = vpop.f32.mrb[54].mxu0 }
 0x1de   : > { %v2536_v52 = vmul.f32 %v2469_v26, %v2410_v18  ;;  %v2392_v8 = vadd.f32 %v5855_v55, %v2366_v60  ;;  %v2229_v4 = vpop.f32.mrb[55].mxu0 }
 0x1df   : > { %v2537_v11 = vmul.f32 %v2473_v16, %v2411_v1  ;;  %v2393_v13 = vadd.f32 %v5855_v55, %v2367_v5  ;;  %v2265_v14 = vpop.f32.mrb[52].mxu1  ;;  %2643 = vrot.lane.b32.xlu0 %v5933_v49, %s5442_s8  ;;  %2628 = vst [vmem:[#allocation2 + $0x20] sm:$0xff] %v5948_v50  ;;  %2645 = vrot.lane.b32.xlu1 %v5948_v50, %s5442_s8 }
 0x1e0   : > { %v2412_v27 = vmax.f32 %v2392_v8, 0.0  ;;  %v2368_v17 = vadd.f32 %v2265_v14, %v5840_v32  ;;  %v2267_v15 = vpop.f32.mrb[53].mxu1  ;;  %v2489_v32 = vrot.slane %v5911_v6, %v2456_v63 }
 0x1e1   : > { %v2413_v19 = vmax.f32 %v2393_v13, 0.0  ;;  %v2369_v21 = vadd.f32 %v2267_v15, %v5842_v36  ;;  %v2269_v40 = vpop.f32.mrb[54].mxu1  ;;  %v5965_v25 = vpack.c.bf16 %v2537_v11, %v2536_v52  ;;  %v2422_v36 = vld [vmem:[%s6600_s1 + $0x10] sm:$0xf] }
 0x1e2   : > { %v2538_v56 = vmul.f32 %v2477_v9, %v2412_v27  ;;  %v2394_v23 = vadd.f32 %v5855_v55, %v2368_v17  ;;  %v2270_v24 = vpop.f32.mrb[55].mxu1  ;;  %v2493_v47 = vrot.slane %v2422_v36, %v5853_v38  ;;  %v2497_v26 = vrot.slane %v2422_v36, %v5861_v42  ;;  %v4533_v9 = vld [vmem:[%s6604_s5] sm:$0xff] }
 0x1e3   : > { %v2539_v58 = vmul.f32 %v2481_v22, %v2413_v19  ;;  %v2395_v35 = vadd.f32 %v5855_v55, %v2369_v21  ;;  %v2306_v10 = vpop.f32.mrb[56].mxu0  ;;  %2712 = vrot.lane.b32.xlu0 %v5933_v49, %s5441_s30  ;;  %2714 = vrot.lane.b32.xlu1 %v5948_v50, %s5441_s30  ;;  %2629 = vst [vmem:[#allocation2 + $0x28] sm:$0xff] %v5965_v25 }
 0x1e4   : > { %v2414_v37 = vmax.f32 %v2394_v23, 0.0  ;;  %v2370_v29 = vadd.f32 %v2306_v10, %v5844_v41  ;;  %v2308_v12 = vpop.f32.mrb[57].mxu0  ;;  %v2501_v60 = vrot.slane %v2422_v36, %v5866_v61  ;;  %v2505_v7 = vrot.slane %v2422_v36, %v5871_v2 }
 0x1e5   : > { %v2415_v3 = vmax.f32 %v2395_v35, 0.0  ;;  %v2371_v63 = vadd.f32 %v2308_v12, %v5846_v44  ;;  %v5985_v6 = vpack.c.bf16 %v2539_v58, %v2538_v56  ;;  %v2310_v39 = vpop.f32.mrb[58].mxu0 }
 0x1e6   : > { %v2540_v30 = vmul.f32 %v2485_v31, %v2414_v37  ;;  %v2396_v33 = vadd.f32 %v5855_v55, %v2370_v29  ;;  %v2311_v34 = vpop.f32.mrb[59].mxu0 }
 0x1e7   : > { %v2541_v53 = vmul.f32 %v2489_v32, %v2415_v3  ;;  %v2397_v54 = vadd.f32 %v5855_v55, %v2371_v63  ;;  %v2347_v45 = vpop.f32.mrb[56].mxu1  ;;  %2647 = vrot.lane.b32.xlu0 %v5965_v25, %s5442_s8  ;;  %2630 = vst [vmem:[#allocation2 + $0x30] sm:$0xff] %v5985_v6  ;;  %2649 = vrot.lane.b32.xlu1 %v5985_v6, %s5442_s8 }
 0x1e8   : > { %v2416_v41 = vmax.f32 %v2396_v33, 0.0  ;;  %v2372_v44 = vadd.f32 %v2347_v45, %v5848_v48  ;;  %v2349_v57 = vpop.f32.mrb[57].mxu1 }
 0x1e9   : > { %v2417_v38 = vmax.f32 %v2397_v54, 0.0  ;;  %v2373_v46 = vadd.f32 %v2349_v57, %v5850_v51  ;;  %v2351_v16 = vpop.f32.mrb[58].mxu1  ;;  %v5998_v59 = vpack.c.bf16 %v2541_v53, %v2540_v30 }
 0x1ea   : > { %v2542_v42 = vmul.f32 %v2493_v47, %v2416_v41  ;;  %v2398_v18 = vadd.f32 %v5855_v55, %v2372_v44  ;;  %v2352_v62 = vpop.f32.mrb[59].mxu1 }
 0x1eb   : > { %v2543_v1 = vmul.f32 %v2497_v26, %v2417_v38  ;;  %v2399_v5 = vadd.f32 %v5855_v55, %v2373_v46  ;;  %2716 = vrot.lane.b32.xlu0 %v5965_v25, %s5441_s30  ;;  %2718 = vrot.lane.b32.xlu1 %v5985_v6, %s5441_s30  ;;  %2631 = vst [vmem:[#allocation2 + $0x38] sm:$0xff] %v5998_v59 }
 0x1ec   : > { %v2418_v48 = vmax.f32 %v2398_v18, 0.0 }
 0x1ed   : > { %v2419_v51 = vmax.f32 %v2399_v5, 0.0  ;;  %v6009_v52 = vpack.c.bf16 %v2543_v1, %v2542_v42 }
 0x1ee   : > { %v2544_v8 = vmul.f32 %v2501_v60, %v2418_v48 }
 0x1ef   : > { %v2545_v61 = vmul.f32 %v2505_v7, %v2419_v51  ;;  %2651 = vrot.lane.b32.xlu0 %v5998_v59, %s5442_s8  ;;  %2632 = vst [vmem:[#allocation2 + $0x40] sm:$0xff] %v6009_v52  ;;  %2653 = vrot.lane.b32.xlu1 %v6009_v52, %s5442_s8  ;;  %v6072_v51 = vld [vmem:[%s6603_s4 + $0x4] sm:$0xf] }
 0x1f0   : > { %v5211_v55 = vpack.c.bf16 %v2544_v8, %v2544_v8 }
 0x1f1   : > { %v5212_v2 = vpack.c.bf16 %v2545_v61, %v2544_v8 }
 0x1f2   : > { %2633 = vst [vmem:[#allocation2 + $0x48] sm:$0xf] %v5211_v55 }
 0x1f3   : > { %2720 = vrot.lane.b32.xlu0 %v5998_v59, %s5441_s30  ;;  %2722 = vrot.lane.b32.xlu1 %v6009_v52, %s5441_s30 }
 0x1f7   : > { %2655 = vrot.lane.b32.xlu0 %v5212_v2, %s5442_s8  ;;  %2724 = vrot.lane.b32.xlu1 %v5212_v2, %s5441_s30 }
 0x1fb   : > { %4536 = vperm.xlu0 %5273, %v4533_v9  }
 0x241   : > { %v2638_v4 = vpop.permute.xlu1 %2637 }
 0x242   : > { %v2657_v13 = vrot.slane %v2638_v4, 4 }
 0x245   : > { %v2640_v11 = vpop.permute.xlu1 %2639 }
 0x246   : > { %v2658_v22 = vrot.slane %v2640_v11, 4 }
 0x248   : > { %v2667_v14 = vsel %vm493_vm0, %v2657_v13, %v2658_v22 }
 0x249   : > { %v6027_v27 = vsel %vm495_vm1, %v2638_v4, %v2667_v14  ;;  %v2642_v17 = vpop.permute.xlu0 %2641  ;;  %v2707_v15 = vpop.permute.xlu1 %2706 }
 0x24a   : > { %2696 = vst [vmem:[#allocation2 + $0x58] sm:$0xff] %v6027_v27  ;;  %v2659_v19 = vrot.slane %v2642_v17, 4  ;;  %v2726_v31 = vrot.slane %v2707_v15, 4 }
 0x24c   : > { %v2669_v21 = vsel %vm493_vm0, %v2658_v22, %v2659_v19 }
 0x24d   : > { %v6032_v40 = vsel %vm495_vm1, %v2640_v11, %v2669_v21  ;;  %v2709_v56 = vpop.permute.xlu0 %2708  ;;  %v2711_v23 = vpop.permute.xlu1 %2710 }
 0x24e   : > { %2697 = vst [vmem:[#allocation2 + $0x60] sm:$0xff] %v6032_v40  ;;  %v2727_v24 = vrot.slane %v2709_v56, 4  ;;  %v2728_v58 = vrot.slane %v2711_v23, 4 }
 0x250   : > { %v2736_v35 = vsel %vm493_vm0, %v2726_v31, %v2727_v24  ;;  %v2738_v32 = vsel %vm493_vm0, %v2727_v24, %v2728_v58 }
 0x251   : > { %v6038_v10 = vsel %vm584_vm2, %v2707_v15, %v2736_v35  ;;  %v6041_v36 = vsel %vm584_vm2, %v2709_v56, %v2738_v32  ;;  %v2644_v37 = vpop.permute.xlu0 %2643  ;;  %v2646_v29 = vpop.permute.xlu1 %2645  ;;  %v5386_v53 = vld [vmem:[#allocation2 + $0x4] ss:$88 sps:$4 sm:$0xff]  }
 0x252   : > { %2765 = vst [vmem:[#allocation2 + $0xb0] sm:$0xff] %v6038_v10  ;;  %2766 = vst [vmem:[#allocation2 + $0xb8] sm:$0xff] %v6041_v36  ;;  %v2660_v12 = vrot.slane %v2644_v37, 4  ;;  %v2661_v3 = vrot.slane %v2646_v29, 4 }
 0x254   : > { %v2671_v63 = vsel %vm493_vm0, %v2659_v19, %v2660_v12  ;;  %v2673_v39 = vsel %vm493_vm0, %v2660_v12, %v2661_v3 }
 0x255   : > { %v6048_v30 = vsel %vm495_vm1, %v2642_v17, %v2671_v63  ;;  %v6051_v33 = vsel %vm495_vm1, %v2644_v37, %v2673_v39  ;;  %v2713_v47 = vpop.permute.xlu0 %2712  ;;  %v2715_v34 = vpop.permute.xlu1 %2714  ;;  %v5388_v54 = vld [vmem:[#allocation2 + $0x8] ss:$88 sps:$4 sm:$0xff]   ;;  %v5391_v9 = vld [vmem:[#allocation2 + $0xc] ss:$88 sps:$4 sm:$0xff]  }
 0x256   : > { %2698 = vst [vmem:[#allocation2 + $0x68] sm:$0xff] %v6048_v30  ;;  %2699 = vst [vmem:[#allocation2 + $0x70] sm:$0xff] %v6051_v33  ;;  %v2729_v26 = vrot.slane %v2713_v47, 4  ;;  %v2730_v45 = vrot.slane %v2715_v34, 4  ;;  %3017 = vmatprep.subr.bf16.mxu0 %v5388_v54 }
 0x257   : > { %3018 = vmatpush1.bf16.msra.mxu0 %v5386_v53 }
 0x258   : > { %v2740_v41 = vsel %vm493_vm0, %v2728_v58, %v2729_v26  ;;  %v2742_v44 = vsel %vm493_vm0, %v2729_v26, %v2730_v45 }
 0x259   : > { %v6058_v57 = vsel %vm584_vm2, %v2711_v23, %v2740_v41  ;;  %v6061_v38 = vsel %vm584_vm2, %v2713_v47, %v2742_v44  ;;  %v2648_v46 = vpop.permute.xlu0 %2647  ;;  %v2650_v16 = vpop.permute.xlu1 %2649  ;;  %v2823_v42 = vld [vmem:[#allocation2 + $0xb4] sm:$0xff] }
 0x25a   : > { %2767 = vst [vmem:[#allocation2 + $0xc0] sm:$0xff] %v6058_v57  ;;  %2768 = vst [vmem:[#allocation2 + $0xc8] sm:$0xff] %v6061_v38  ;;  %v2662_v18 = vrot.slane %v2648_v46, 4  ;;  %v2663_v60 = vrot.slane %v2650_v16, 4  ;;  %v5050_v62 = vcombine.high %v2823_v42, %v2823_v42  ;;  %v5049_v1 = vcombine.low %v2823_v42, %v2823_v42 }
 0x25c   : > { %v2675_v5 = vsel %vm493_vm0, %v2661_v3, %v2662_v18  ;;  %v2677_v7 = vsel %vm493_vm0, %v2662_v18, %v2663_v60  ;;  %5066 = vmatprep.subr.msk.bf16.mxu0 %vm493_vm0, %v5050_v62  ;;  %v2967_v48 = vsel %vm493_vm0, %v5049_v1, 0 }
 0x25d   : > { %v6075_v8 = vsel %vm495_vm1, %v2646_v29, %v2675_v5  ;;  %v6078_v61 = vsel %vm495_vm1, %v2648_v46, %v2677_v7  ;;  %v2717_v55 = vpop.permute.xlu0 %2716  ;;  %v2719_v2 = vpop.permute.xlu1 %2718  ;;  %3020 = vmatpush1.bf16.msra.mxu0 %v2967_v48  ;;  %v5393_v4 = vld [vmem:[#allocation2 + $0x10] ss:$88 sps:$4 sm:$0xff]   ;;  %v5394_v15 = vld [vmem:[#allocation2 + $0x14] ss:$88 sps:$4 sm:$0xff]  }
 0x25e   : > { %2700 = vst [vmem:[#allocation2 + $0x78] sm:$0xff] %v6075_v8  ;;  %2701 = vst [vmem:[#allocation2 + $0x80] sm:$0xff] %v6078_v61  ;;  %v2731_v11 = vrot.slane %v2717_v55, 4  ;;  %v2732_v13 = vrot.slane %v2719_v2, 4  ;;  %3058 = vmatprep.subr.bf16.mxu1 %v5393_v4  ;;  %v5396_v22 = vld [vmem:[#allocation2 + $0x18] ss:$88 sps:$4 sm:$0xff]  }
 0x25f   : > { %3059 = vmatpush1.bf16.msra.mxu1 %v5391_v9  ;;  %3099 = vmatprep.subr.bf16.mxu0 %v5396_v22  ;;  %v5401_v18 = vld [vmem:[#allocation2 + $0x1c] ss:$88 sps:$4 sm:$0xff]  }
 0x260   : > { %v2744_v14 = vsel %vm493_vm0, %v2730_v45, %v2731_v11  ;;  %v2746_v17 = vsel %vm493_vm0, %v2731_v11, %v2732_v13  ;;  %5067 = vmatmul.mubr.msk.bf16.vlgmr.msra.gmra.mrb[60].mxu0 %vm2961_vm5, %v6072_v51 }
 0x261   : > { %v6087_v19 = vsel %vm584_vm2, %v2715_v34, %v2744_v14  ;;  %v6090_v21 = vsel %vm584_vm2, %v2717_v55, %v2746_v17  ;;  %v2652_v56 = vpop.permute.xlu0 %2651  ;;  %v2654_v23 = vpop.permute.xlu1 %2653  ;;  %v2824_v31 = vld [vmem:[#allocation2 + $0xbc] sm:$0xff]  ;;  %v2825_v24 = vld [vmem:[#allocation2 + $0xc4] sm:$0xff]  ;;  %3131 = vmatprep.mubr.bf16.mxu0 %v5443_v28  ;;  %3100 = vmatpush1.bf16.msra.mxu0 %v5394_v15 }
 0x262   : > { %2769 = vst [vmem:[#allocation2 + $0xd0] sm:$0xff] %v6087_v19  ;;  %2770 = vst [vmem:[#allocation2 + $0xd8] sm:$0xff] %v6090_v21  ;;  %v2664_v58 = vrot.slane %v2652_v56, 4  ;;  %v2665_v35 = vrot.slane %v2654_v23, 4  ;;  %v5052_v32 = vcombine.high %v2824_v31, %v2824_v31  ;;  %v5054_v37 = vcombine.high %v2825_v24, %v2825_v24 }
 0x263   : > { %v5051_v29 = vcombine.low %v2824_v31, %v2824_v31  ;;  %v5053_v12 = vcombine.low %v2825_v24, %v2825_v24 }
 0x264   : > { %v2679_v3 = vsel %vm493_vm0, %v2663_v60, %v2664_v58  ;;  %v2681_v63 = vsel %vm493_vm0, %v2664_v58, %v2665_v35  ;;  %5068 = vmatprep.subr.msk.bf16.mxu1 %vm493_vm0, %v5052_v32  ;;  %5070 = vmatprep.subr.msk.bf16.mxu0 %vm493_vm0, %v5054_v37 }
 0x265   : > { %v6100_v39 = vsel %vm495_vm1, %v2650_v16, %v2679_v3  ;;  %v6103_v47 = vsel %vm495_vm1, %v2652_v56, %v2681_v63  ;;  %v2721_v34 = vpop.permute.xlu0 %2720  ;;  %v2973_v53 = vsel %vm493_vm0, %v5051_v29, 0  ;;  %v2723_v54 = vpop.permute.xlu1 %2722  ;;  %v2979_v26 = vsel %vm493_vm0, %v5053_v12, 0  ;;  %v5403_v44 = vld [vmem:[#allocation2 + $0x20] ss:$88 sps:$4 sm:$0xff]   ;;  %v5404_v1 = vld [vmem:[#allocation2 + $0x24] ss:$88 sps:$4 sm:$0xff]  }
 0x266   : > { %2702 = vst [vmem:[#allocation2 + $0x88] sm:$0xff] %v6100_v39  ;;  %2703 = vst [vmem:[#allocation2 + $0x90] sm:$0xff] %v6103_v47  ;;  %v2733_v45 = vrot.slane %v2721_v34, 4  ;;  %3061 = vmatpush1.bf16.msra.mxu1 %v2973_v53  ;;  %v2734_v41 = vrot.slane %v2723_v54, 4  ;;  %3102 = vmatpush1.bf16.msra.mxu0 %v2979_v26  ;;  %v5406_v46 = vld [vmem:[#allocation2 + $0x28] ss:$88 sps:$4 sm:$0xff]  }
 0x267   : > { %3140 = vmatprep.subr.bf16.mxu1 %v5403_v44  ;;  %3181 = vmatprep.subr.bf16.mxu0 %v5406_v46  ;;  %v5411_v37 = vld [vmem:[#allocation2 + $0x2c] ss:$88 sps:$4 sm:$0xff]  }
 0x268   : > { %v2748_v16 = vsel %vm493_vm0, %v2732_v13, %v2733_v45  ;;  %v2750_v42 = vsel %vm493_vm0, %v2733_v45, %v2734_v41 }
 0x269   : > { %v6112_v60 = vsel %vm584_vm2, %v2719_v2, %v2748_v16  ;;  %v6115_v62 = vsel %vm584_vm2, %v2721_v34, %v2750_v42  ;;  %5069 = vmatmul.mubr.msk.bf16.vlgmr.msra.gmra.mrb[60].mxu1 %vm2961_vm5, %v6072_v51  ;;  %5071 = vmatmul.mubr.msk.bf16.vlgmr.msra.gmra.mrb[64].mxu0 %vm2961_vm5, %v6072_v51  ;;  %v2656_v5 = vpop.permute.xlu0 %2655  ;;  %v2725_v7 = vpop.permute.xlu1 %2724  ;;  %v2826_v48 = vld [vmem:[#allocation2 + $0xcc] sm:$0xff]  ;;  %v2827_v55 = vld [vmem:[#allocation2 + $0xd4] sm:$0xff]  ;;  %v5444_v16 = vmov 0.0  }
 0x26a   : > { %2771 = vst [vmem:[#allocation2 + $0xe0] sm:$0xff] %v6112_v60  ;;  %2772 = vst [vmem:[#allocation2 + $0xe8] sm:$0xff] %v6115_v62  ;;  %v2666_v2 = vrot.slane %v2656_v5, 4  ;;  %3141 = vmatpush1.bf16.msra.mxu1 %v5401_v18  ;;  %v2735_v9 = vrot.slane %v2725_v7, 4  ;;  %v5056_v4 = vcombine.high %v2826_v48, %v2826_v48  ;;  %v5058_v11 = vcombine.high %v2827_v55, %v2827_v55 }
 0x26b   : > { %3182 = vmatpush1.bf16.msra.mxu0 %v5404_v1  ;;  %v5055_v13 = vcombine.low %v2826_v48, %v2826_v48  ;;  %v5057_v22 = vcombine.low %v2827_v55, %v2827_v55  ;;  %3172 = vmatprep.mubr.bf16.mxu1 %v5443_v28  ;;  %v5084_v48 = vcombine.high %v5885_v43, %v6027_v27 }
 0x26c   : > { %v2683_v14 = vsel %vm493_vm0, %v2665_v35, %v2666_v2  ;;  %v2685_v17 = vsel %vm495_vm1, %v2656_v5, %v2666_v2  ;;  %v2752_v15 = vsel %vm493_vm0, %v2734_v41, %v2735_v9  ;;  %v2754_v56 = vsel %vm584_vm2, %v2725_v7, %v2735_v9  ;;  %5072 = vmatprep.subr.msk.bf16.mxu1 %vm493_vm0, %v5056_v4 }
 0x26d   : > { %v6130_v31 = vsel %vm495_vm1, %v2654_v23, %v2683_v14  ;;  %2705 = vst [vmem:[#allocation2 + $0xa0] sm:$0xf] %v2685_v17  ;;  %v6133_v24 = vsel %vm584_vm2, %v2723_v54, %v2752_v15  ;;  %2774 = vst [vmem:[#allocation2 + $0xf8] sm:$0xf] %v2754_v56  ;;  %5074 = vmatprep.subr.msk.bf16.mxu0 %vm493_vm0, %v5058_v11  ;;  %v2985_v58 = vsel %vm493_vm0, %v5055_v13, 0  ;;  %v2991_v35 = vsel %vm493_vm0, %v5057_v22, 0 }
 0x26e   : > { %3213 = vmatprep.mubr.bf16.mxu0 %v5443_v28  ;;  %2704 = vst [vmem:[#allocation2 + $0x98] sm:$0xff] %v6130_v31  ;;  %2773 = vst [vmem:[#allocation2 + $0xf0] sm:$0xff] %v6133_v24  ;;  %3143 = vmatpush1.bf16.msra.mxu1 %v2985_v58  ;;  %v5413_v23 = vld [vmem:[#allocation2 + $0x30] ss:$88 sps:$4 sm:$0xff]   ;;  %v5414_v29 = vld [vmem:[#allocation2 + $0x34] ss:$88 sps:$4 sm:$0xff]   ;;  %v6167_v2 = vcombine.high %v5900_v0, %v6032_v40  ;;  %v5083_v9 = vcombine.low %v5885_v43, %v6027_v27 }
 0x26f   : > { %v5416_v32 = vld [vmem:[#allocation2 + $0x38] ss:$88 sps:$4 sm:$0xff]   ;;  %3184 = vmatpush1.bf16.msra.mxu0 %v2991_v35  ;;  %3222 = vmatprep.subr.bf16.mxu1 %v5413_v23  ;;  %v5421_v46 = vld [vmem:[#allocation2 + $0x3c] ss:$88 sps:$4 sm:$0xff]   ;;  %v6174_v4 = vcombine.low %v5900_v0, %v6032_v40  ;;  %v5101_v11 = vcombine.high %v6038_v10, %v6038_v10  ;;  %v5100_v13 = vcombine.low %v6038_v10, %v6038_v10 }
 0x270   : > { %3263 = vmatprep.subr.bf16.mxu0 %v5416_v32  ;;  %v6186_v43 = vcombine.high %v6041_v36, %v6041_v36  ;;  %v5102_v0 = vcombine.low %v6041_v36, %v6041_v36  ;;  %v6198_v40 = vcombine.high %v5918_v20, %v6048_v30  ;;  %v6206_v36 = vcombine.high %v5933_v49, %v6051_v33 }
 0x271   : > { %5073 = vmatmul.mubr.msk.bf16.vlgmr.msra.gmra.mrb[64].mxu1 %vm2961_vm5, %v6072_v51  ;;  %v2828_v12 = vld [vmem:[#allocation2 + $0xdc] sm:$0xff]  ;;  %v2829_v3 = vld [vmem:[#allocation2 + $0xe4] sm:$0xff]  ;;  %v3518_v27 = vsel %vm493_vm0, %v5100_v13, 0  ;;  %v6217_v22 = vcombine.low %v5918_v20, %v6048_v30  ;;  %v6222_v14 = vcombine.low %v5933_v49, %v6051_v33  ;;  %v6228_v17 = vcombine.high %v6058_v57, %v6058_v57 }
 0x272   : > { %5075 = vmatmul.mubr.msk.bf16.vlgmr.msra.gmra.mrb[68].mxu0 %vm2961_vm5, %v6072_v51  ;;  %3223 = vmatpush1.bf16.msra.mxu1 %v5411_v37  ;;  %v5060_v63 = vcombine.high %v2828_v12, %v2828_v12  ;;  %v5062_v34 = vcombine.high %v2829_v3, %v2829_v3  ;;  %v5059_v53 = vcombine.low %v2828_v12, %v2828_v12  ;;  %v6202_v10 = vsel %vm493_vm0, %v5102_v0, 0 }
 0x273   : > { %3264 = vmatpush1.bf16.msra.mxu0 %v5414_v29  ;;  %v5061_v54 = vcombine.low %v2829_v3, %v2829_v3  ;;  %3254 = vmatprep.mubr.bf16.mxu1 %v5443_v28  ;;  %v5104_v15 = vcombine.low %v6058_v57, %v6058_v57  ;;  %v6237_v20 = vcombine.high %v6061_v38, %v6061_v38 }
 0x274   : > { %5076 = vmatprep.subr.msk.bf16.mxu1 %vm493_vm0, %v5060_v63  ;;  %5078 = vmatprep.subr.msk.bf16.mxu0 %vm493_vm0, %v5062_v34  ;;  %v2997_v26 = vsel %vm493_vm0, %v5059_v53, 0  ;;  %v5106_v49 = vcombine.low %v6061_v38, %v6061_v38  ;;  %v6252_v33 = vcombine.high %v5948_v50, %v6075_v8  ;;  %v6261_v38 = vcombine.high %v5965_v25, %v6078_v61  ;;  %v5134_v63 = vld [vmem:[%s6603_s4 + $0x8] sm:$0xf] }
 0x275   : > { %v3003_v45 = vsel %vm493_vm0, %v5061_v54, 0  ;;  %3295 = vmatprep.mubr.bf16.mxu0 %v5443_v28  ;;  %v5423_v41 = vld [vmem:[#allocation2 + $0x40] ss:$88 sps:$4 sm:$0xff]   ;;  %v2830_v44 = vld [vmem:[#allocation2 + $0xec] sm:$0xff]  ;;  %v5424_v42 = vld [vmem:[#allocation2 + $0x44] ss:$88 sps:$4 sm:$0xff]   ;;  %v6267_v56 = vcombine.low %v5948_v50, %v6075_v8  ;;  %v6272_v58 = vcombine.low %v5965_v25, %v6078_v61  ;;  %v6278_v35 = vcombine.high %v6087_v19, %v6087_v19 }
 0x276   : > { %3225 = vmatpush1.bf16.msra.mxu1 %v2997_v26  ;;  %v5064_v18 = vcombine.high %v2830_v44, %v2830_v44  ;;  %v5063_v1 = vcombine.low %v2830_v44, %v2830_v44  ;;  %v5427_v5 = vld [vmem:[#allocation2 + $0xf4] ss:$0 sps:$4 sm:$0xff]   ;;  %v6248_v30 = vsel %vm493_vm0, %v5104_v15, 0  ;;  %v6257_v57 = vsel %vm493_vm0, %v5106_v49, 0  ;;  %v5430_v54 = vld [vmem:[#allocation2 + $0x48] ss:$88 sps:$4 sm:$0xff]  }
 0x277   : > { %3266 = vmatpush1.bf16.msra.mxu0 %v3003_v45  ;;  %3304 = vmatprep.subr.bf16.mxu1 %v5423_v41  ;;  %v3015_v55 = vsel %vm493_vm0, %v5427_v5, 0  ;;  %v5108_v23 = vcombine.low %v6087_v19, %v6087_v19  ;;  %v6287_v50 = vcombine.high %v6090_v21, %v6090_v21  ;;  %v5110_v25 = vcombine.low %v6090_v21, %v6090_v21  ;;  %v5431_v41 = vld [vmem:[#allocation2 + $0xf8] ss:$0 sps:$4 sm:$0xff]  }
 0x278   : > { %5234 = vmatprep.subr.bf16.mxu0 %v5444_v16  ;;  %v3009_v7 = vsel %vm493_vm0, %v5063_v1, 0  ;;  %v6302_v61 = vcombine.high %v5985_v6, %v6100_v39  ;;  %v5098_v21 = vcombine.high %v5998_v59, %v6103_v47  ;;  %v6312_v32 = vcombine.low %v5985_v6, %v6100_v39 }
 0x279   : > { %5077 = vmatmul.mubr.msk.bf16.vlgmr.msra.gmra.mrb[68].mxu1 %vm2961_vm5, %v6072_v51  ;;  %v6298_v8 = vsel %vm493_vm0, %v5108_v23, 0  ;;  %v3548_v19 = vsel %vm493_vm0, %v5110_v25, 0  ;;  %v5097_v37 = vcombine.low %v5998_v59, %v6103_v47  ;;  %v5113_v29 = vcombine.high %v6112_v60, %v6112_v60 }
 0x27a   : > { %5079 = vmatmul.mubr.msk.bf16.vlgmr.msra.gmra.mrb[72].mxu0 %vm2961_vm5, %v6072_v51  ;;  %3305 = vmatpush1.bf16.msra.mxu1 %v5421_v46  ;;  %v5112_v12 = vcombine.low %v6112_v60, %v6112_v60  ;;  %v5115_v6 = vcombine.high %v6115_v62, %v6115_v62  ;;  %v5114_v59 = vcombine.low %v6115_v62, %v6115_v62  ;;  %v5428_v60 = vld [vmem:[#allocation2 + $0x40] ss:$88 sps:$4 sm:$0xff]   ;;  %v5429_v62 = vld [vmem:[#allocation2 + $0xf0] ss:$0 sps:$4 sm:$0xff]  }
 0x27b   : > { %5235 = vmatpush3.bf16.msra.mxu0 %v5424_v42  ;;  %5080 = vmatprep.subr.msk.bf16.mxu1 %vm493_vm0, %v5064_v18  ;;  %v3566_v3 = vsel %vm493_vm0, %v5429_v62, 0  ;;  %v5150_v34 = vcombine.high %v6009_v52, %v6130_v31  ;;  %v5149_v53 = vcombine.low %v6009_v52, %v6130_v31  ;;  %v5167_v26 = vcombine.high %v6133_v24, %v6133_v24 }
 0x27c   : > { %5236 = vmatprep.subr.bf16.mxu0 %v5444_v16  ;;  %3336 = vmatprep.mubr.bf16.mxu1 %v5443_v28  ;;  %v3554_v39 = vsel %vm493_vm0, %v5112_v12, 0  ;;  %v3560_v47 = vsel %vm493_vm0, %v5114_v59, 0  ;;  %v5166_v45 = vcombine.low %v6133_v24, %v6133_v24  ;;  %v4146_v31 = vsel %vm493_vm0, %v5431_v41, 0 }
 0x27d   : > { %5238 = vmatprep.mubr.msk.bf16.mxu0 %vm5445_vm6, %v5444_v16 }
 0x27e   : > { %3307 = vmatpush1.bf16.msra.mxu1 %v3009_v7  ;;  %v4140_v52 = vsel %vm493_vm0, %v5166_v45, 0 }
 0x27f   : > { %5237 = vmatpush3.bf16.msra.mxu0 %v3015_v55  ;;  %3568 = vmatprep.subr.bf16.mxu1 %v5084_v48 }
 0x280   : > { %3609 = vmatprep.subr.bf16.mxu0 %v6167_v2 }
 0x281   : > { %5081 = vmatmul.mubr.msk.bf16.vlgmr.msra.gmra.mrb[72].mxu1 %vm2961_vm5, %v6072_v51 }
 0x282   : > { %5239 = vmatmul.mubr.msk.bf16.vlgmr.msra.gmra.mrb[76].mxu0 %vm2961_vm5, %v6072_v51  ;;  %3569 = vmatpush1.bf16.msra.mxu1 %v5083_v9  ;;  %v6211_v51 = vld [vmem:[%s6603_s4] sm:$0xf] }
 0x283   : > { %3610 = vmatpush1.bf16.msra.mxu0 %v6174_v4  ;;  %5117 = vmatprep.subr.msk.bf16.mxu1 %vm493_vm0, %v5101_v11 }
 0x284   : > { %5119 = vmatprep.subr.msk.bf16.mxu0 %vm493_vm0, %v6186_v43  ;;  %3600 = vmatprep.mubr.bf16.mxu1 %v5443_v28 }
 0x285   : > { %3641 = vmatprep.mubr.bf16.mxu0 %v5443_v28 }
 0x286   : > { %3571 = vmatpush1.bf16.msra.mxu1 %v3518_v27 }
 0x287   : > { %3612 = vmatpush1.bf16.msra.mxu0 %v6202_v10  ;;  %3650 = vmatprep.subr.bf16.mxu1 %v6198_v40 }
 0x288   : > { %3691 = vmatprep.subr.bf16.mxu0 %v6206_v36 }
 0x289   : > { %5118 = vmatmul.mubr.msk.bf16.vlgmr.msra.gmra.mrb[76].mxu1 %vm2961_vm5, %v6211_v51 }
 0x28a   : > { %5120 = vmatmul.mubr.msk.bf16.vlgmr.msra.gmra.mrb[80].mxu0 %vm2961_vm5, %v6211_v51  ;;  %3651 = vmatpush1.bf16.msra.mxu1 %v6217_v22 }
 0x28b   : > { %3692 = vmatpush1.bf16.msra.mxu0 %v6222_v14  ;;  %5121 = vmatprep.subr.msk.bf16.mxu1 %vm493_vm0, %v6228_v17 }
 0x28c   : > { %5123 = vmatprep.subr.msk.bf16.mxu0 %vm493_vm0, %v6237_v20  ;;  %3682 = vmatprep.mubr.bf16.mxu1 %v5443_v28 }
 0x28d   : > { %3723 = vmatprep.mubr.bf16.mxu0 %v5443_v28 }
 0x28e   : > { %3653 = vmatpush1.bf16.msra.mxu1 %v6248_v30 }
 0x28f   : > { %3694 = vmatpush1.bf16.msra.mxu0 %v6257_v57  ;;  %3732 = vmatprep.subr.bf16.mxu1 %v6252_v33 }
 0x290   : > { %3773 = vmatprep.subr.bf16.mxu0 %v6261_v38 }
 0x291   : > { %5122 = vmatmul.mubr.msk.bf16.vlgmr.msra.gmra.mrb[80].mxu1 %vm2961_vm5, %v6211_v51 }
 0x292   : > { %5124 = vmatmul.mubr.msk.bf16.vlgmr.msra.gmra.mrb[84].mxu0 %vm2961_vm5, %v6211_v51  ;;  %3733 = vmatpush1.bf16.msra.mxu1 %v6267_v56 }
 0x293   : > { %3774 = vmatpush1.bf16.msra.mxu0 %v6272_v58  ;;  %5125 = vmatprep.subr.msk.bf16.mxu1 %vm493_vm0, %v6278_v35 }
 0x294   : > { %5127 = vmatprep.subr.msk.bf16.mxu0 %vm493_vm0, %v6287_v50  ;;  %3764 = vmatprep.mubr.bf16.mxu1 %v5443_v28 }
 0x295   : > { %3805 = vmatprep.mubr.bf16.mxu0 %v5443_v28 }
 0x296   : > { %3735 = vmatpush1.bf16.msra.mxu1 %v6298_v8 }
 0x297   : > { %3776 = vmatpush1.bf16.msra.mxu0 %v3548_v19  ;;  %3814 = vmatprep.subr.bf16.mxu1 %v6302_v61 }
 0x298   : > { %3855 = vmatprep.subr.bf16.mxu0 %v5098_v21 }
 0x299   : > { %5126 = vmatmul.mubr.msk.bf16.vlgmr.msra.gmra.mrb[84].mxu1 %vm2961_vm5, %v6211_v51 }
 0x29a   : > { %5128 = vmatmul.mubr.msk.bf16.vlgmr.msra.gmra.mrb[88].mxu0 %vm2961_vm5, %v6211_v51  ;;  %3815 = vmatpush1.bf16.msra.mxu1 %v6312_v32 }
 0x29b   : > { %3856 = vmatpush1.bf16.msra.mxu0 %v5097_v37  ;;  %5129 = vmatprep.subr.msk.bf16.mxu1 %vm493_vm0, %v5113_v29 }
 0x29c   : > { %5131 = vmatprep.subr.msk.bf16.mxu0 %vm493_vm0, %v5115_v6  ;;  %3846 = vmatprep.mubr.bf16.mxu1 %v5443_v28 }
 0x29d   : > { %3887 = vmatprep.mubr.bf16.mxu0 %v5443_v28 }
 0x29e   : > { %3817 = vmatpush1.bf16.msra.mxu1 %v3554_v39 }
 0x29f   : > { %3858 = vmatpush1.bf16.msra.mxu0 %v3560_v47  ;;  %5242 = vmatprep.subr.bf16.mxu1 %v5444_v16 }
 0x2a0   : > { %4148 = vmatprep.subr.bf16.mxu0 %v6167_v2 }
 0x2a1   : > { %5130 = vmatmul.mubr.msk.bf16.vlgmr.msra.gmra.mrb[88].mxu1 %vm2961_vm5, %v6211_v51 }
 0x2a2   : > { %5132 = vmatmul.mubr.msk.bf16.vlgmr.msra.gmra.mrb[92].mxu0 %vm2961_vm5, %v6211_v51  ;;  %5243 = vmatpush3.bf16.msra.mxu1 %v5428_v60 }
 0x2a3   : > { %4149 = vmatpush1.bf16.msra.mxu0 %v6174_v4  ;;  %5244 = vmatprep.subr.bf16.mxu1 %v5444_v16 }
 0x2a4   : > { %5169 = vmatprep.subr.msk.bf16.mxu0 %vm493_vm0, %v6186_v43  ;;  %5246 = vmatprep.mubr.msk.bf16.mxu1 %vm5445_vm6, %v5444_v16 }
 0x2a5   : > { %4180 = vmatprep.mubr.bf16.mxu0 %v5443_v28 }
 0x2a6   : > { %5245 = vmatpush3.bf16.msra.mxu1 %v3566_v3 }
 0x2a7   : > { %4151 = vmatpush1.bf16.msra.mxu0 %v6202_v10  ;;  %4189 = vmatprep.subr.bf16.mxu1 %v6198_v40 }
 0x2a8   : > { %4230 = vmatprep.subr.bf16.mxu0 %v6206_v36 }
 0x2a9   : > { %5247 = vmatmul.mubr.msk.bf16.vlgmr.msra.gmra.mrb[92].mxu1 %vm2961_vm5, %v6211_v51 }
 0x2aa   : > { %5170 = vmatmul.mubr.msk.bf16.vlgmr.msra.gmra.mrb[96].mxu0 %vm2961_vm5, %v5134_v63  ;;  %4190 = vmatpush1.bf16.msra.mxu1 %v6217_v22 }
 0x2ab   : > { %4231 = vmatpush1.bf16.msra.mxu0 %v6222_v14  ;;  %5171 = vmatprep.subr.msk.bf16.mxu1 %vm493_vm0, %v6228_v17 }
 0x2ac   : > { %5173 = vmatprep.subr.msk.bf16.mxu0 %vm493_vm0, %v6237_v20  ;;  %4221 = vmatprep.mubr.bf16.mxu1 %v5443_v28 }
 0x2ad   : > { %4262 = vmatprep.mubr.bf16.mxu0 %v5443_v28 }
 0x2ae   : > { %4192 = vmatpush1.bf16.msra.mxu1 %v6248_v30 }
 0x2af   : > { %4233 = vmatpush1.bf16.msra.mxu0 %v6257_v57  ;;  %4271 = vmatprep.subr.bf16.mxu1 %v6252_v33 }
 0x2b0   : > { %4312 = vmatprep.subr.bf16.mxu0 %v6261_v38 }
 0x2b1   : > { %5172 = vmatmul.mubr.msk.bf16.vlgmr.msra.gmra.mrb[96].mxu1 %vm2961_vm5, %v5134_v63 }
 0x2b2   : > { %5174 = vmatmul.mubr.msk.bf16.vlgmr.msra.gmra.mrb[100].mxu0 %vm2961_vm5, %v5134_v63  ;;  %4272 = vmatpush1.bf16.msra.mxu1 %v6267_v56 }
 0x2b3   : > { %4313 = vmatpush1.bf16.msra.mxu0 %v6272_v58  ;;  %5175 = vmatprep.subr.msk.bf16.mxu1 %vm493_vm0, %v6278_v35 }
 0x2b4   : > { %5177 = vmatprep.subr.msk.bf16.mxu0 %vm493_vm0, %v6287_v50  ;;  %4303 = vmatprep.mubr.bf16.mxu1 %v5443_v28 }
 0x2b5   : > { %4344 = vmatprep.mubr.bf16.mxu0 %v5443_v28 }
 0x2b6   : > { %4274 = vmatpush1.bf16.msra.mxu1 %v6298_v8 }
 0x2b7   : > { %4315 = vmatpush1.bf16.msra.mxu0 %v3548_v19  ;;  %4353 = vmatprep.subr.bf16.mxu1 %v6302_v61 }
 0x2b8   : > { %4394 = vmatprep.subr.bf16.mxu0 %v5098_v21 }
 0x2b9   : > { %5176 = vmatmul.mubr.msk.bf16.vlgmr.msra.gmra.mrb[100].mxu1 %vm2961_vm5, %v5134_v63 }
 0x2ba   : > { %5178 = vmatmul.mubr.msk.bf16.vlgmr.msra.gmra.mrb[104].mxu0 %vm2961_vm5, %v5134_v63  ;;  %4354 = vmatpush1.bf16.msra.mxu1 %v6312_v32 }
 0x2bb   : > { %4395 = vmatpush1.bf16.msra.mxu0 %v5097_v37  ;;  %5179 = vmatprep.subr.msk.bf16.mxu1 %vm493_vm0, %v5113_v29 }
 0x2bc   : > { %5181 = vmatprep.subr.msk.bf16.mxu0 %vm493_vm0, %v5115_v6  ;;  %4385 = vmatprep.mubr.bf16.mxu1 %v5443_v28 }
 0x2bd   : > { %4426 = vmatprep.mubr.bf16.mxu0 %v5443_v28 }
 0x2be   : > { %4356 = vmatpush1.bf16.msra.mxu1 %v3554_v39 }
 0x2bf   : > { %4397 = vmatpush1.bf16.msra.mxu0 %v3560_v47  ;;  %4435 = vmatprep.subr.bf16.mxu1 %v5150_v34 }
 0x2c0   : > { %5250 = vmatprep.subr.bf16.mxu0 %v5444_v16 }
 0x2c1   : > { %5180 = vmatmul.mubr.msk.bf16.vlgmr.msra.gmra.mrb[104].mxu1 %vm2961_vm5, %v5134_v63 }
 0x2c2   : > { %5182 = vmatmul.mubr.msk.bf16.vlgmr.msra.gmra.mrb[108].mxu0 %vm2961_vm5, %v5134_v63  ;;  %4436 = vmatpush1.bf16.msra.mxu1 %v5149_v53 }
 0x2c3   : > { %5251 = vmatpush3.bf16.msra.mxu0 %v5430_v54  ;;  %5183 = vmatprep.subr.msk.bf16.mxu1 %vm493_vm0, %v5167_v26 }
 0x2c4   : > { %5252 = vmatprep.subr.bf16.mxu0 %v5444_v16  ;;  %4467 = vmatprep.mubr.bf16.mxu1 %v5443_v28 }
 0x2c5   : > { %5254 = vmatprep.mubr.msk.bf16.mxu0 %vm5445_vm6, %v5444_v16 }
 0x2c6   : > { %4438 = vmatpush1.bf16.msra.mxu1 %v4140_v52 }
 0x2c7   : > { %5253 = vmatpush3.bf16.msra.mxu0 %v4146_v31 }
 0x2c9   : > { %5184 = vmatmul.mubr.msk.bf16.vlgmr.msra.gmra.mrb[108].mxu1 %vm2961_vm5, %v5134_v63 }
 0x2ca   : > { %5255 = vmatmul.mubr.msk.bf16.vlgmr.msra.gmra.mrb[112].mxu0 %vm2961_vm5, %v5134_v63 }
 0x333   : > { %v3051_v24 = vpop.f32.mrb[60].mxu0 }
 0x334   : > { %v3053_v44 = vpop.f32.mrb[61].mxu0 }
 0x335   : > { %v3055_v46 = vpop.f32.mrb[62].mxu0 }
 0x336   : > { %v3056_v42 = vpop.f32.mrb[63].mxu0 }
 0x33c   : > { %v3092_v18 = vpop.f32.mrb[60].mxu1  ;;  %v3133_v1 = vpop.f32.mrb[64].mxu0 }
 0x33d   : > { %v3094_v28 = vpop.f32.mrb[61].mxu1  ;;  %v3135_v5 = vpop.f32.mrb[65].mxu0 }
 0x33e   : > { %v3096_v7 = vpop.f32.mrb[62].mxu1  ;;  %v3137_v48 = vpop.f32.mrb[66].mxu0 }
 0x33f   : > { %v3097_v55 = vpop.f32.mrb[63].mxu1  ;;  %v3138_v16 = vpop.f32.mrb[67].mxu0 }
 0x344   : > { %v3174_v2 = vpop.f32.mrb[64].mxu1 }
 0x345   : > { %v3176_v9 = vpop.f32.mrb[65].mxu1  ;;  %v3215_v4 = vpop.f32.mrb[68].mxu0 }
 0x346   : > { %v3178_v11 = vpop.f32.mrb[66].mxu1  ;;  %v3217_v13 = vpop.f32.mrb[69].mxu0 }
 0x347   : > { %v3179_v43 = vpop.f32.mrb[67].mxu1  ;;  %v3219_v0 = vpop.f32.mrb[70].mxu0 }
 0x348   : > { %v3220_v27 = vpop.f32.mrb[71].mxu0 }
 0x34c   : > { %v3256_v40 = vpop.f32.mrb[68].mxu1 }
 0x34d   : > { %v3258_v10 = vpop.f32.mrb[69].mxu1  ;;  %v3297_v36 = vpop.f32.mrb[72].mxu0 }
 0x34e   : > { %v3260_v51 = vpop.f32.mrb[70].mxu1  ;;  %v3299_v22 = vpop.f32.mrb[73].mxu0 }
 0x34f   : > { %v3261_v14 = vpop.f32.mrb[71].mxu1  ;;  %v3301_v17 = vpop.f32.mrb[74].mxu0 }
 0x350   : > { %v3302_v15 = vpop.f32.mrb[75].mxu0 }
 0x354   : > { %v3338_v20 = vpop.f32.mrb[72].mxu1 }
 0x355   : > { %v3340_v49 = vpop.f32.mrb[73].mxu1  ;;  %v3379_v30 = vpop.f32.mrb[76].mxu0 }
 0x356   : > { %v3342_v33 = vpop.f32.mrb[74].mxu1  ;;  %v5240_v57 = vpop.f32.mrb[77].mxu0 }
 0x357   : > { %v3343_v38 = vpop.f32.mrb[75].mxu1  ;;  %v3382_v56 = vpop.f32.mrb[78].mxu0 }
 0x358   : > { %v5241_v58 = vpop.f32.mrb[79].mxu0 }
 0x35c   : > { %v3602_v35 = vpop.f32.mrb[76].mxu1 }
 0x35d   : > { %v3603_v23 = vadd.f32 %v3602_v35, %v3051_v24  ;;  %v3643_v50 = vpop.f32.mrb[80].mxu0  ;;  %v3604_v25 = vpop.f32.mrb[77].mxu1 }
 0x35e   : > { %v6409_v8 = vadd.f32 %v3643_v50, %v3092_v18  ;;  %v3605_v61 = vadd.f32 %v3604_v25, %v3053_v44  ;;  %v3645_v19 = vpop.f32.mrb[81].mxu0  ;;  %v3606_v21 = vpop.f32.mrb[78].mxu1 }
 0x35f   : > { %v6411_v32 = vadd.f32 %v3645_v19, %v3094_v28  ;;  %v3607_v37 = vpop.f32.mrb[79].mxu1  ;;  %v3647_v29 = vpop.f32.mrb[82].mxu0 }
 0x360   : > { %v3648_v12 = vpop.f32.mrb[83].mxu0 }
 0x364   : > { %v3684_v6 = vpop.f32.mrb[80].mxu1 }
 0x365   : > { %v3685_v59 = vadd.f32 %v3684_v6, %v3133_v1  ;;  %v3725_v39 = vpop.f32.mrb[84].mxu0  ;;  %v3686_v47 = vpop.f32.mrb[81].mxu1 }
 0x366   : > { %v6413_v60 = vadd.f32 %v3725_v39, %v3174_v2  ;;  %v3687_v62 = vadd.f32 %v3686_v47, %v3135_v5  ;;  %v3727_v3 = vpop.f32.mrb[85].mxu0  ;;  %v3688_v63 = vpop.f32.mrb[82].mxu1 }
 0x367   : > { %v6415_v34 = vadd.f32 %v3727_v3, %v3176_v9  ;;  %v3689_v53 = vpop.f32.mrb[83].mxu1  ;;  %v3729_v54 = vpop.f32.mrb[86].mxu0 }
 0x368   : > { %v3730_v26 = vpop.f32.mrb[87].mxu0 }
 0x36c   : > { %v3766_v45 = vpop.f32.mrb[84].mxu1 }
 0x36d   : > { %v6417_v41 = vadd.f32 %v3766_v45, %v3215_v4  ;;  %v3807_v52 = vpop.f32.mrb[88].mxu0  ;;  %v3768_v31 = vpop.f32.mrb[85].mxu1 }
 0x36e   : > { %v6419_v24 = vadd.f32 %v3807_v52, %v3256_v40  ;;  %v6421_v44 = vadd.f32 %v3768_v31, %v3217_v13  ;;  %v3809_v46 = vpop.f32.mrb[89].mxu0  ;;  %v3770_v42 = vpop.f32.mrb[86].mxu1 }
 0x36f   : > { %v6423_v18 = vadd.f32 %v3809_v46, %v3258_v10  ;;  %v3771_v1 = vpop.f32.mrb[87].mxu1  ;;  %v3811_v28 = vpop.f32.mrb[90].mxu0 }
 0x370   : > { %v3812_v5 = vpop.f32.mrb[91].mxu0  ;;  %v6433_v40 = vpop.permute.xlu0 %4536 }
 0x374   : > { %v3848_v7 = vpop.f32.mrb[88].mxu1 }
 0x375   : > { %v6425_v48 = vadd.f32 %v3848_v7, %v3297_v36  ;;  %v3889_v55 = vpop.f32.mrb[92].mxu0  ;;  %v3850_v16 = vpop.f32.mrb[89].mxu1 }
 0x376   : > { %v6427_v2 = vadd.f32 %v3889_v55, %v3338_v20  ;;  %v6429_v9 = vadd.f32 %v3850_v16, %v3299_v22  ;;  %v3891_v4 = vpop.f32.mrb[93].mxu0  ;;  %v3852_v11 = vpop.f32.mrb[90].mxu1 }
 0x377   : > { %v6431_v13 = vadd.f32 %v3891_v4, %v3340_v49  ;;  %v3853_v43 = vpop.f32.mrb[91].mxu1  ;;  %v3893_v0 = vpop.f32.mrb[94].mxu0 }
 0x378   : > { %v3894_v27 = vpop.f32.mrb[95].mxu0 }
 0x37c   : > { %v3930_v10 = vpop.f32.mrb[92].mxu1 }
 0x37d   : > { %v6435_v51 = vadd.f32 %v3930_v10, %v3379_v30  ;;  %v4182_v36 = vpop.f32.mrb[96].mxu0  ;;  %v5248_v14 = vpop.f32.mrb[93].mxu1 }
 0x37e   : > { %v4516_v17 = vadd.f32 %v4182_v36, %v3603_v23  ;;  %v4184_v15 = vpop.f32.mrb[97].mxu0  ;;  %v3933_v20 = vpop.f32.mrb[94].mxu1 }
 0x37f   : > { %v4517_v22 = vadd.f32 %v4184_v15, %v3605_v61  ;;  %v5249_v33 = vpop.f32.mrb[95].mxu1  ;;  %v4186_v57 = vpop.f32.mrb[98].mxu0 }
 0x380   : > { %v4539_v49 = vadd.f32 %v6433_v40, %v4516_v17  ;;  %v4187_v38 = vpop.f32.mrb[99].mxu0 }
 0x381   : > { %v4540_v56 = vadd.f32 %v6433_v40, %v4517_v22 }
 0x382   : > { %v6440_v58 = vmax.f32 %v4539_v49, 0.0 }
 0x383   : > { %v6442_v35 = vmax.f32 %v4540_v56, 0.0 }
 0x384   : > { %v4223_v30 = vpop.f32.mrb[96].mxu1 }
 0x385   : > { %v5213_v23 = vpack.c.bf16 %v6442_v35, %v6440_v58  ;;  %v4518_v50 = vadd.f32 %v4223_v30, %v6409_v8  ;;  %v4264_v25 = vpop.f32.mrb[100].mxu0  ;;  %v4225_v61 = vpop.f32.mrb[97].mxu1  ;;  %v5274_v19 = vpack.i.bf16 %v6442_v35, %v6440_v58 }
 0x386   : > { %v4520_v21 = vadd.f32 %v4264_v25, %v3685_v59  ;;  %v4519_v37 = vadd.f32 %v4225_v61, %v6411_v32  ;;  %v4266_v29 = vpop.f32.mrb[101].mxu0  ;;  %v4227_v12 = vpop.f32.mrb[98].mxu1 }
 0x387   : > { %4637 = vst [vmem:[%s6447_s14] sm:$0xff] %v5213_v23  ;;  %v4541_v6 = vadd.f32 %v6433_v40, %v4518_v50  ;;  %v4521_v39 = vadd.f32 %v4266_v29, %v3687_v62  ;;  %5275 = vrot.lane.b32.xlu1 %v5274_v19, %s5442_s8  ;;  %v4228_v47 = vpop.f32.mrb[99].mxu1  ;;  %v4268_v3 = vpop.f32.mrb[102].mxu0 }
 0x388   : > { %v4543_v8 = vadd.f32 %v6433_v40, %v4520_v21  ;;  %v4542_v63 = vadd.f32 %v6433_v40, %v4519_v37  ;;  %v4269_v53 = vpop.f32.mrb[103].mxu0 }
 0x389   : > { %v6460_v54 = vmax.f32 %v4541_v6, 0.0  ;;  %v4544_v32 = vadd.f32 %v6433_v40, %v4521_v39 }
 0x38a   : > { %v6463_v59 = vmax.f32 %v4543_v8, 0.0  ;;  %v6465_v26 = vmax.f32 %v4542_v63, 0.0 }
 0x38b   : > { %v6467_v62 = vmax.f32 %v4544_v32, 0.0 }
 0x38c   : > { %v5214_v45 = vpack.c.bf16 %v6465_v26, %v6460_v54  ;;  %v4305_v52 = vpop.f32.mrb[100].mxu1  ;;  %v5279_v31 = vpack.i.bf16 %v6465_v26, %v6460_v54 }
 0x38d   : > { %v5215_v46 = vpack.c.bf16 %v6467_v62, %v6463_v59  ;;  %v4522_v42 = vadd.f32 %v4305_v52, %v6413_v60  ;;  %v4346_v1 = vpop.f32.mrb[104].mxu0  ;;  %v4307_v28 = vpop.f32.mrb[101].mxu1  ;;  %v5284_v5 = vpack.i.bf16 %v6467_v62, %v6463_v59 }
 0x38e   : > { %4638 = vst [vmem:[%s6447_s14 + $0x8] sm:$0xff] %v5214_v45  ;;  %v4524_v7 = vadd.f32 %v4346_v1, %v6417_v41  ;;  %v4523_v55 = vadd.f32 %v4307_v28, %v6415_v34  ;;  %v4348_v16 = vpop.f32.mrb[105].mxu0  ;;  %5280 = vrot.lane.b32.xlu0 %v5279_v31, %s5442_s8  ;;  %v4309_v4 = vpop.f32.mrb[102].mxu1 }
 0x38f   : > { %4639 = vst [vmem:[%s6447_s14 + $0x10] sm:$0xff] %v5215_v46  ;;  %v4545_v11 = vadd.f32 %v6433_v40, %v4522_v42  ;;  %v4525_v43 = vadd.f32 %v4348_v16, %v6421_v44  ;;  %5285 = vrot.lane.b32.xlu1 %v5284_v5, %s5442_s8  ;;  %v4310_v60 = vpop.f32.mrb[103].mxu1  ;;  %v4350_v0 = vpop.f32.mrb[106].mxu0 }
 0x390   : > { %v4547_v27 = vadd.f32 %v6433_v40, %v4524_v7  ;;  %v4546_v41 = vadd.f32 %v6433_v40, %v4523_v55  ;;  %v4351_v10 = vpop.f32.mrb[107].mxu0 }
 0x391   : > { %v6488_v34 = vmax.f32 %v4545_v11, 0.0  ;;  %v4548_v36 = vadd.f32 %v6433_v40, %v4525_v43 }
 0x392   : > { %v6491_v14 = vmax.f32 %v4547_v27, 0.0  ;;  %v6493_v17 = vmax.f32 %v4546_v41, 0.0 }
 0x393   : > { %v6495_v44 = vmax.f32 %v4548_v36, 0.0 }
 0x394   : > { %v5216_v15 = vpack.c.bf16 %v6493_v17, %v6488_v34  ;;  %v4387_v20 = vpop.f32.mrb[104].mxu1  ;;  %v5289_v22 = vpack.i.bf16 %v6493_v17, %v6488_v34 }
 0x395   : > { %v5217_v33 = vpack.c.bf16 %v6495_v44, %v6491_v14  ;;  %v4526_v57 = vadd.f32 %v4387_v20, %v6419_v24  ;;  %v4428_v49 = vpop.f32.mrb[108].mxu0  ;;  %v4389_v38 = vpop.f32.mrb[105].mxu1  ;;  %v5294_v56 = vpack.i.bf16 %v6495_v44, %v6491_v14 }
 0x396   : > { %4640 = vst [vmem:[%s6447_s14 + $0x18] sm:$0xff] %v5216_v15  ;;  %v4528_v30 = vadd.f32 %v4428_v49, %v6425_v48  ;;  %v4527_v23 = vadd.f32 %v4389_v38, %v6423_v18  ;;  %v4430_v50 = vpop.f32.mrb[109].mxu0  ;;  %5290 = vrot.lane.b32.xlu0 %v5289_v22, %s5442_s8  ;;  %v4391_v25 = vpop.f32.mrb[106].mxu1 }
 0x397   : > { %4641 = vst [vmem:[%s6447_s14 + $0x20] sm:$0xff] %v5217_v33  ;;  %v4549_v61 = vadd.f32 %v6433_v40, %v4526_v57  ;;  %v4529_v19 = vadd.f32 %v4430_v50, %v6429_v9  ;;  %5295 = vrot.lane.b32.xlu1 %v5294_v56, %s5442_s8  ;;  %v4392_v24 = vpop.f32.mrb[107].mxu1  ;;  %v4432_v21 = vpop.f32.mrb[110].mxu0 }
 0x398   : > { %v4551_v37 = vadd.f32 %v6433_v40, %v4528_v30  ;;  %v4550_v48 = vadd.f32 %v6433_v40, %v4527_v23  ;;  %v4433_v29 = vpop.f32.mrb[111].mxu0 }
 0x399   : > { %v6516_v18 = vmax.f32 %v4549_v61, 0.0  ;;  %v4552_v12 = vadd.f32 %v6433_v40, %v4529_v19 }
 0x39a   : > { %v6519_v6 = vmax.f32 %v4551_v37, 0.0  ;;  %v6521_v39 = vmax.f32 %v4550_v48, 0.0 }
 0x39b   : > { %v6523_v9 = vmax.f32 %v4552_v12, 0.0 }
 0x39c   : > { %v5218_v47 = vpack.c.bf16 %v6521_v39, %v6516_v18  ;;  %v4469_v3 = vpop.f32.mrb[108].mxu1  ;;  %v5299_v8 = vpack.i.bf16 %v6521_v39, %v6516_v18 }
 0x39d   : > { %v5219_v63 = vpack.c.bf16 %v6523_v9, %v6519_v6  ;;  %v4530_v53 = vadd.f32 %v4469_v3, %v6427_v2  ;;  %v4510_v32 = vpop.f32.mrb[112].mxu0  ;;  %v4471_v45 = vpop.f32.mrb[109].mxu1  ;;  %v5304_v52 = vpack.i.bf16 %v6523_v9, %v6519_v6 }
 0x39e   : > { %4642 = vst [vmem:[%s6447_s14 + $0x28] sm:$0xff] %v5218_v47  ;;  %v4532_v31 = vadd.f32 %v4510_v32, %v6435_v51  ;;  %v4531_v46 = vadd.f32 %v4471_v45, %v6431_v13  ;;  %5300 = vrot.lane.b32.xlu0 %v5299_v8, %s5442_s8  ;;  %v4473_v42 = vpop.f32.mrb[110].mxu1  ;;  %v5256_v1 = vpop.f32.mrb[113].mxu0 }
 0x39f   : > { %4643 = vst [vmem:[%s6447_s14 + $0x30] sm:$0xff] %v5219_v63  ;;  %v4553_v28 = vadd.f32 %v6433_v40, %v4530_v53  ;;  %5305 = vrot.lane.b32.xlu1 %v5304_v52, %s5442_s8  ;;  %v4474_v2 = vpop.f32.mrb[111].mxu1  ;;  %v4513_v5 = vpop.f32.mrb[114].mxu0 }
 0x3a0   : > { %v4555_v7 = vadd.f32 %v6433_v40, %v4532_v31  ;;  %v4554_v55 = vadd.f32 %v6433_v40, %v4531_v46  ;;  %v5257_v16 = vpop.f32.mrb[115].mxu0 }
 0x3a1   : > { %v6543_v51 = vmax.f32 %v4553_v28, 0.0 }
 0x3a2   : > { %v4572_v13 = vmax.f32 %v4555_v7, 0.0  ;;  %v6545_v4 = vmax.f32 %v4554_v55, 0.0 }
 0x3a4   : > { %v5220_v11 = vpack.c.bf16 %v6545_v4, %v6543_v51  ;;  %4747 = vrot.lane.b32.xlu1 %v4572_v13, %s5442_s8  ;;  %v5309_v43 = vpack.i.bf16 %v6545_v4, %v6543_v51 }
 0x3a6   : > { %4644 = vst [vmem:[%s6447_s14 + $0x38] sm:$0xff] %v5220_v11  ;;  %5310 = vrot.lane.b32.xlu0 %v5309_v43, %s5442_s8  ;;  %s5201_s8 = sshll.u32 %s6608_s25, 5 }
 0x3a7   : > { %s6566_s17 = scalar_lea.vmem %s6606_s7, %s5201_s8 }
 0x3f9   : > { %v5276_v60 = vpop.permute.xlu1 %5275 }
 0x3fa   : > { %v5278_v40 = vunpack.i.h.bf16 %v5276_v60  ;;  %v5277_v0 = vunpack.i.l.bf16 %v5276_v60 }
 0x3fc   : > { %v4652_v41 = vsel %vm495_vm1, %v5277_v0, %v5278_v40 }
 0x3fd   : > { %v4654_v57 = vmax.f32 %v6440_v58, %v4652_v41 }
 0x400   : > { %v5281_v27 = vpop.permute.xlu0 %5280 }
 0x401   : > { %v5283_v10 = vunpack.i.h.bf16 %v5281_v27  ;;  %v5282_v36 = vunpack.i.l.bf16 %v5281_v27  ;;  %v5286_v15 = vpop.permute.xlu1 %5285 }
 0x402   : > { %v5287_v20 = vunpack.i.l.bf16 %v5286_v15  ;;  %v5288_v30 = vunpack.i.h.bf16 %v5286_v15 }
 0x403   : > { %v4658_v22 = vsel %vm495_vm1, %v5278_v40, %v5282_v36  ;;  %v4665_v33 = vsel %vm495_vm1, %v5282_v36, %v5283_v10 }
 0x404   : > { %v4660_v49 = vmax.f32 %v6442_v35, %v4658_v22  ;;  %v4667_v38 = vmax.f32 %v6460_v54, %v4665_v33  ;;  %v4671_v56 = vsel %vm495_vm1, %v5283_v10, %v5287_v20  ;;  %v4678_v58 = vsel %vm495_vm1, %v5287_v20, %v5288_v30 }
 0x405   : > { %v4673_v23 = vmax.f32 %v6465_v26, %v4671_v56  ;;  %v4680_v48 = vmax.f32 %v6463_v59, %v4678_v58 }
 0x406   : > { %v4661_v50 = vmax.f32 %v4654_v57, %v4660_v49 }
 0x407   : > { %v4674_v25 = vmax.f32 %v4667_v38, %v4673_v23 }
 0x408   : > { %v5291_v61 = vpop.permute.xlu0 %5290 }
 0x409   : > { %v5221_v35 = vpack.c.bf16 %v4674_v25, %v4661_v50  ;;  %v5293_v19 = vunpack.i.h.bf16 %v5291_v61  ;;  %v5292_v54 = vunpack.i.l.bf16 %v5291_v61  ;;  %v5296_v24 = vpop.permute.xlu1 %5295 }
 0x40a   : > { %v5297_v21 = vunpack.i.l.bf16 %v5296_v24  ;;  %v5298_v3 = vunpack.i.h.bf16 %v5296_v24 }
 0x40b   : > { %4785 = vst [vmem:[%s6566_s17] sm:$0xff] %v5221_v35  ;;  %v4684_v37 = vsel %vm495_vm1, %v5288_v30, %v5292_v54  ;;  %v4691_v26 = vsel %vm495_vm1, %v5292_v54, %v5293_v19 }
 0x40c   : > { %v4686_v29 = vmax.f32 %v6467_v62, %v4684_v37  ;;  %v4693_v12 = vmax.f32 %v6488_v34, %v4691_v26  ;;  %v4697_v47 = vsel %vm495_vm1, %v5293_v19, %v5297_v21  ;;  %v4704_v45 = vsel %vm495_vm1, %v5297_v21, %v5298_v3 }
 0x40d   : > { %v4699_v8 = vmax.f32 %v6493_v17, %v4697_v47  ;;  %v4706_v34 = vmax.f32 %v6491_v14, %v4704_v45 }
 0x40e   : > { %v4687_v63 = vmax.f32 %v4680_v48, %v4686_v29 }
 0x40f   : > { %v4700_v53 = vmax.f32 %v4693_v12, %v4699_v8 }
 0x410   : > { %v5301_v32 = vpop.permute.xlu0 %5300 }
 0x411   : > { %v5222_v52 = vpack.c.bf16 %v4700_v53, %v4687_v63  ;;  %v5303_v31 = vunpack.i.h.bf16 %v5301_v32  ;;  %v5302_v46 = vunpack.i.l.bf16 %v5301_v32  ;;  %v5306_v42 = vpop.permute.xlu1 %5305 }
 0x412   : > { %v5307_v1 = vunpack.i.l.bf16 %v5306_v42  ;;  %v5308_v5 = vunpack.i.h.bf16 %v5306_v42 }
 0x413   : > { %4786 = vst [vmem:[%s6566_s17 + $0x8] sm:$0xff] %v5222_v52  ;;  %v4710_v59 = vsel %vm495_vm1, %v5298_v3, %v5302_v46  ;;  %v4717_v62 = vsel %vm495_vm1, %v5302_v46, %v5303_v31 }
 0x414   : > { %v4712_v17 = vmax.f32 %v6495_v44, %v4710_v59  ;;  %v4719_v28 = vmax.f32 %v6516_v18, %v4717_v62  ;;  %v4723_v2 = vsel %vm495_vm1, %v5303_v31, %v5307_v1  ;;  %v4730_v11 = vsel %vm495_vm1, %v5307_v1, %v5308_v5 }
 0x415   : > { %v4725_v7 = vmax.f32 %v6521_v39, %v4723_v2  ;;  %v4732_v27 = vmax.f32 %v6519_v6, %v4730_v11 }
 0x416   : > { %v4713_v55 = vmax.f32 %v4706_v34, %v4712_v17  ;;  %v4748_v0 = vpop.permute.xlu1 %4747 }
 0x417   : > { %v4726_v16 = vmax.f32 %v4719_v28, %v4725_v7 }
 0x418   : > { %v5311_v13 = vpop.permute.xlu0 %5310 }
 0x419   : > { %v5223_v43 = vpack.c.bf16 %v4726_v16, %v4713_v55  ;;  %v5313_v60 = vunpack.i.h.bf16 %v5311_v13  ;;  %v5312_v40 = vunpack.i.l.bf16 %v5311_v13 }
 0x41b   : > { %4787 = vst [vmem:[%s6566_s17 + $0x10] sm:$0xff] %v5223_v43  ;;  %v4736_v14 = vsel %vm495_vm1, %v5308_v5, %v5312_v40  ;;  %v4743_v44 = vsel %vm495_vm1, %v5312_v40, %v5313_v60  ;;  %v4749_v18 = vsel %vm495_vm1, %v5313_v60, %v4748_v0 }
 0x41c   : > { %v4738_v39 = vmax.f32 %v6523_v9, %v4736_v14  ;;  %v4745_v41 = vmax.f32 %v6543_v51, %v4743_v44  ;;  %v4751_v10 = vmax.f32 %v6545_v4, %v4749_v18 }
 0x41e   : > { %v4739_v36 = vmax.f32 %v4732_v27, %v4738_v39  ;;  %v4752_v15 = vmax.f32 %v4745_v41, %v4751_v10 }
 0x420   : > { %v5224_v20 = vpack.c.bf16 %v4752_v15, %v4739_v36 }
 0x422   : > { %4788 = vst [vmem:[%s6566_s17 + $0x18] sm:$0xff] %v5224_v20 }
 0x423 PF: > { %s18_s24 = sadd.s32 1, %s5438_s24  }
 0x424   : > { %p15_p4 = scmp.ge.s32.totalorder %s18_s24, 4  }
 0x426   :  { %17 = sbr.rel (!%p15_p4) target bundleno = 1 (0x1), region = 90 }

</bundles_post_ra>
